<compile_context>
chip_gen: v7x
topology: tpu7x:2x2x1
jax: 0.10.0
libtpu: 0.0.40
codegen_flags: <defaults>
</compile_context>

<pallas_src>
import functools
import math

import jax
import jax.numpy as jnp
from jax.experimental import pallas as pl
from jax.experimental.pallas import tpu as pltpu


def _round_up(a, b):
    return ((a + b - 1) // b) * b


def _cdiv(a, b):
    return (a + b - 1) // b


# --------------------------------------------------------------------------- #
# Kernel
# --------------------------------------------------------------------------- #
def mlpbase_kernel(
    x_ref, h_ref, m_ref,
    wg_ref, bg_ref,          # fused GRU weight (2H, 4H) bf16 + bias (1, 4H) f32
    w1_ref, b1_ref,          # fused actor1|critic1 weight (H, 2H) + bias
    w2_ref, b2_ref,          # block-diag actor2/critic2 weight (2H, 2H) + bias
    wv_ref, bv_ref,          # critic_linear weight broadcast to (8, H) + (1,1) bias
    value_ref, actor_ref, hxs_ref,
):
    H = x_ref.shape[1]
    cd = wg_ref.dtype        # matmul compute dtype (bf16)

    h = h_ref[...] * m_ref[...]          # hxs * masks (f32, masks is (TB, 1))

    # ---- GRU step: single fused MXU pass over [x | h] (K = 2H) ----
    # Operands are cast to bf16 BEFORE the concat so only one (TB, 2H) bf16
    # temp is materialized.  g columns: [0:H]=i_r+h_r [H:2H]=i_z+h_z
    # [2H:3H]=i_n [3H:4H]=h_n.
    xh = jnp.concatenate([x_ref[...].astype(cd), h.astype(cd)], axis=1)
    g = jnp.dot(xh, wg_ref[...], preferred_element_type=jnp.float32) + bg_ref[...]

    r = jax.nn.sigmoid(g[:, 0:H])
    z = jax.nn.sigmoid(g[:, H:2 * H])
    n = jnp.tanh(g[:, 2 * H:3 * H] + r * g[:, 3 * H:4 * H])  # i_n+b_in + r*(h_n+b_hn)
    h_new = (1.0 - z) * n + z * h                             # z*h uses f32 h
    hxs_ref[...] = h_new

    # ---- actor/critic layer 1 fused: one (TB,H)@(H,2H) matmul ----
    ac1 = jnp.dot(h_new.astype(cd), w1_ref[...],
                  preferred_element_type=jnp.float32) + b1_ref[...]
    ac1 = jnp.maximum(ac1, 0.0)

    # ---- actor/critic layer 2 fused via block-diagonal (2H,2H) weight ----
    ac2 = jnp.dot(ac1.astype(cd), w2_ref[...],
                  preferred_element_type=jnp.float32) + b2_ref[...]
    ac2 = jnp.maximum(ac2, 0.0)

    actor_ref[...] = ac2[:, 0:H]                              # hidden_actor
    c2 = ac2[:, H:2 * H]                                      # hidden_critic

    # ---- critic_linear, lane-dense: (8,H) @ c2^T -> (8, TB) ----
    # All 8 rows of wv hold the same weight vector, so every row of v is the
    # per-example value; the wrapper reads row 0.  Only 8*TB f32 per tile is
    # written to HBM (vs TB*128 for a lane-padded column).
    v = jnp.dot(wv_ref[...], c2.astype(cd).T,
                preferred_element_type=jnp.float32) + bv_ref[...]
    value_ref[0] = v


# --------------------------------------------------------------------------- #
# Wrapper
# --------------------------------------------------------------------------- #
@functools.partial(jax.jit, static_argnames=("block_n",))
def mlpbase_forward(x, hxs, masks, kparams, block_n=512):
    N, H = x.shape
    if H % 128 != 0:
        raise ValueError("hidden_size must be a multiple of 128 for this kernel")

    # Even number of tiles (>=2): both v7x TensorCores get whole tiles and the
    # next tile's DMA overlaps compute; block_n caps the tile for huge batches.
    n_tiles = max(2, 2 * _cdiv(N, 2 * block_n))
    TB = max(8, _round_up(_cdiv(N, n_tiles), 8))
    G = _cdiv(N, TB)
    grid = (G,)

    wg, bg = kparams["wg"], kparams["bg"]
    w1, b1 = kparams["w1"], kparams["b1"]
    w2, b2 = kparams["w2"], kparams["b2"]
    wv, bv = kparams["wv"], kparams["bv"]
    weights = (wg, bg, w1, b1, w2, b2, wv, bv)

    def row_spec(width):
        return pl.BlockSpec((TB, width), lambda i: (i, 0))

    def const_spec(arr):
        return pl.BlockSpec(arr.shape, lambda i: (0, 0))

    in_specs = [
        row_spec(H),                               # x
        row_spec(H),                               # hxs
        pl.BlockSpec((TB, 1), lambda i: (i, 0)),   # masks
    ] + [const_spec(w) for w in weights]           # VMEM-resident weights/biases

    out_specs = (
        pl.BlockSpec((1, 8, TB), lambda i: (i, 0, 0)),   # value, lane-dense
        row_spec(H),                                      # hidden_actor
        row_spec(H),                                      # rnn_hxs
    )
    out_shape = (
        jax.ShapeDtypeStruct((G, 8, TB), jnp.float32),
        jax.ShapeDtypeStruct((N, H), jnp.float32),
        jax.ShapeDtypeStruct((N, H), jnp.float32),
    )

    w_bytes = sum(math.prod(w.shape) * w.dtype.itemsize for w in weights)
    io_bytes = 4 * N * (2 * H + 1) + 4 * N * 2 * H + 4 * G * 8 * TB + w_bytes
    flops = N * (
        2 * (2 * H) * (4 * H)      # fused GRU matmul
        + 2 * H * (2 * H)          # fused actor1|critic1
        + 2 * (2 * H) * (2 * H)    # block-diag actor2/critic2
        + 2 * 8 * H                # critic_linear (8-row lane-dense)
        + 12 * H                   # gate combines / ReLUs (approx)
    )
    cost = pl.CostEstimate(
        flops=int(flops),
        transcendentals=int(N * 3 * H),
        bytes_accessed=int(io_bytes),
    )

    value_t, actor, hxs_out = pl.pallas_call(
        mlpbase_kernel,
        out_shape=out_shape,
        grid=grid,
        in_specs=in_specs,
        out_specs=out_specs,
        compiler_params=pltpu.CompilerParams(
            dimension_semantics=("parallel",),
            vmem_limit_bytes=32 * 1024 * 1024),
        cost_estimate=cost,
    )(x, hxs, masks, *weights)

    # Tiny post-processing: pick row 0 of each (8, TB) value tile.
    value = value_t[:, 0, :].reshape(G * TB)[:N].reshape(N, 1)
    return value, actor, hxs_out


# --------------------------------------------------------------------------- #
# Parameters
# --------------------------------------------------------------------------- #
def make_params(key, hidden_size):
    """Raw parameters matching the PyTorch module's __init__ (orthogonal
    weights, zero biases).  Weights stored transposed as (in, out)."""
    H = hidden_size
    orth = jax.nn.initializers.orthogonal()
    orth_g = jax.nn.initializers.orthogonal(scale=math.sqrt(2.0))
    ks = jax.random.split(key, 8)

    w_ih = orth(ks[0], (3 * H, H), jnp.float32).T          # (H, 3H) cols: r|z|n
    w_hh = orth(ks[1], (3 * H, H), jnp.float32).T          # (H, 3H)
    b_ih = jnp.zeros((3 * H,), jnp.float32)
    b_hh = jnp.zeros((3 * H,), jnp.float32)

    aw1 = orth_g(ks[2], (H, H), jnp.float32).T
    aw2 = orth_g(ks[3], (H, H), jnp.float32).T
    cw1 = orth_g(ks[4], (H, H), jnp.float32).T
    cw2 = orth_g(ks[5], (H, H), jnp.float32).T
    ab1 = jnp.zeros((H,), jnp.float32)
    ab2 = jnp.zeros((H,), jnp.float32)
    cb1 = jnp.zeros((H,), jnp.float32)
    cb2 = jnp.zeros((H,), jnp.float32)

    clw = orth_g(ks[6], (1, H), jnp.float32).T              # (H, 1)
    clb = jnp.zeros((1,), jnp.float32)

    return dict(w_ih=w_ih, w_hh=w_hh, b_ih=b_ih, b_hh=b_hh,
                aw1=aw1, ab1=ab1, aw2=aw2, ab2=ab2,
                cw1=cw1, cb1=cb1, cw2=cw2, cb2=cb2,
                clw=clw, clb=clb)


def pack_params(p, compute_dtype=jnp.bfloat16):
    """Fuse raw params into the kernel's layout.

    wg (2H,4H): [x,h] @ wg gives columns [r-combined | z-combined | i_n | h_n].
    w1 (H,2H):  [aw1 | cw1].   w2 (2H,2H): block-diag(aw2, cw2).
    wv (8,H):   clw^T broadcast to 8 rows (lane-dense value head).
    """
    H = p["aw1"].shape[0]

    wg = jnp.zeros((2 * H, 4 * H), jnp.float32)
    wg = wg.at[:H, 0:3 * H].set(p["w_ih"])                     # r | z | i_n
    wg = wg.at[H:, 0:2 * H].set(p["w_hh"][:, 0:2 * H])          # r | z (hidden)
    wg = wg.at[H:, 3 * H:4 * H].set(p["w_hh"][:, 2 * H:3 * H])  # h_n
    bg = jnp.concatenate(
        [p["b_ih"][0:2 * H] + p["b_hh"][0:2 * H],
         p["b_ih"][2 * H:3 * H],
         p["b_hh"][2 * H:3 * H]], axis=0).reshape(1, 4 * H)

    w1 = jnp.concatenate([p["aw1"], p["cw1"]], axis=1)          # (H, 2H)
    b1 = jnp.concatenate([p["ab1"], p["cb1"]], axis=0).reshape(1, 2 * H)

    w2 = jnp.zeros((2 * H, 2 * H), jnp.float32)
    w2 = w2.at[:H, :H].set(p["aw2"])
    w2 = w2.at[H:, H:].set(p["cw2"])
    b2 = jnp.concatenate([p["ab2"], p["cb2"]], axis=0).reshape(1, 2 * H)

    wv = jnp.broadcast_to(p["clw"][:, 0][None, :], (8, H))      # (8, H)
    bv = p["clb"].reshape(1, 1).astype(jnp.float32)             # (1, 1)

    return dict(
        wg=wg.astype(compute_dtype), bg=bg,
        w1=w1.astype(compute_dtype), b1=b1,
        w2=w2.astype(compute_dtype), b2=b2,
        wv=wv.astype(compute_dtype), bv=bv,
    )


# --------------------------------------------------------------------------- #
# Pure-JAX references
# --------------------------------------------------------------------------- #
def reference_forward(x, hxs, masks, p):
    """f32 reference of the module's forward pass."""
    H = x.shape[1]
    h = hxs * masks
    gi = x @ p["w_ih"] + p["b_ih"]
    gh = h @ p["w_hh"] + p["b_hh"]
    r = jax.nn.sigmoid(gi[:, :H] + gh[:, :H])
    z = jax.nn.sigmoid(gi[:, H:2 * H] + gh[:, H:2 * H])
    n = jnp.tanh(gi[:, 2 * H:] + r * gh[:, 2 * H:])
    h_new = (1.0 - z) * n + z * h
    a = jnp.maximum(h_new @ p["aw1"] + p["ab1"], 0.0)
    a = jnp.maximum(a @ p["aw2"] + p["ab2"], 0.0)
    c = jnp.maximum(h_new @ p["cw1"] + p["cb1"], 0.0)
    c = jnp.maximum(c @ p["cw2"] + p["cb2"], 0.0)
    v = c @ p["clw"] + p["clb"]
    return v, a, h_new


def reference_forward_matched(x, hxs, masks, p, compute_dtype=jnp.bfloat16):
    """Reference with the same bf16-operand / f32-accumulate matmuls."""
    cd = compute_dtype

    def mm(a, w):
        return jnp.dot(a.astype(cd), w.astype(cd),
                       preferred_element_type=jnp.float32)

    H = x.shape[1]
    h = hxs * masks
    gi = mm(x, p["w_ih"]) + p["b_ih"]
    gh = mm(h, p["w_hh"]) + p["b_hh"]
    r = jax.nn.sigmoid(gi[:, :H] + gh[:, :H])
    z = jax.nn.sigmoid(gi[:, H:2 * H] + gh[:, H:2 * H])
    n = jnp.tanh(gi[:, 2 * H:] + r * gh[:, 2 * H:])
    h_new = (1.0 - z) * n + z * h
    a = jnp.maximum(mm(h_new, p["aw1"]) + p["ab1"], 0.0)
    a = jnp.maximum(mm(a, p["aw2"]) + p["ab2"], 0.0)
    c = jnp.maximum(mm(h_new, p["cw1"]) + p["cb1"], 0.0)
    c = jnp.maximum(mm(c, p["cw2"]) + p["cb2"], 0.0)
    v = mm(c, p["clw"]) + p["clb"]
    return v, a, h_new


# --------------------------------------------------------------------------- #
if __name__ == "__main__":
    HIDDEN = 128   # MLPBase default; recurrent=True => num_inputs = hidden_size
    N = 200        # batch (single-step GRU branch); exercises 2 tiles + partial

    key = jax.random.PRNGKey(0)
    k_p, k_x, k_h, k_m = jax.random.split(key, 4)

    raw_params = make_params(k_p, HIDDEN)
    kparams = pack_params(raw_params, compute_dtype=jnp.bfloat16)

    x = jax.random.normal(k_x, (N, HIDDEN), jnp.float32)
    hxs = jax.random.normal(k_h, (N, HIDDEN), jnp.float32)
    masks = (jax.random.uniform(k_m, (N, 1)) > 0.3).astype(jnp.float32)

    value, hidden_actor, rnn_hxs = mlpbase_forward(x, hxs, masks, kparams)
    jax.block_until_ready((value, hidden_actor, rnn_hxs))

    assert value.shape == (N, 1)
    assert hidden_actor.shape == (N, HIDDEN)
    assert rnn_hxs.shape == (N, HIDDEN)

    # tight check vs. a reference using the same bf16-operand matmuls
    v_m, a_m, h_m = reference_forward_matched(x, hxs, masks, raw_params)
    assert jnp.allclose(value, v_m, atol=2e-2), float(jnp.max(jnp.abs(value - v_m)))
    assert jnp.allclose(hidden_actor, a_m, atol=2e-2), float(jnp.max(jnp.abs(hidden_actor - a_m)))
    assert jnp.allclose(rnn_hxs, h_m, atol=2e-2), float(jnp.max(jnp.abs(rnn_hxs - h_m)))

    # loose sanity check vs. the pure-f32 reference (bf16 matmul error budget)
    v_f, a_f, h_f = reference_forward(x, hxs, masks, raw_params)
    assert jnp.allclose(value, v_f, atol=2e-1)
    assert jnp.allclose(hidden_actor, a_f, atol=2e-1)
    assert jnp.allclose(rnn_hxs, h_f, atol=2e-1)

    print("KERNEL_OK")
</pallas_src>

<mosaic_0001>
module attributes {stable_mosaic.version = 11 : i64} {
  func.func @mlpbase_kernel(%arg0: i32, %arg1: memref<104x128xf32, #tpu.memory_space<vmem>>, %arg2: memref<104x128xf32, #tpu.memory_space<vmem>>, %arg3: memref<104x1xf32, #tpu.memory_space<vmem>>, %arg4: memref<256x512xbf16, #tpu.memory_space<vmem>>, %arg5: memref<1x512xf32, #tpu.memory_space<vmem>>, %arg6: memref<128x256xbf16, #tpu.memory_space<vmem>>, %arg7: memref<1x256xf32, #tpu.memory_space<vmem>>, %arg8: memref<256x256xbf16, #tpu.memory_space<vmem>>, %arg9: memref<1x256xf32, #tpu.memory_space<vmem>>, %arg10: memref<8x128xbf16, #tpu.memory_space<vmem>>, %arg11: memref<1x1xf32, #tpu.memory_space<vmem>>, %arg12: memref<1x8x104xf32, #tpu.memory_space<vmem>>, %arg13: memref<104x128xf32, #tpu.memory_space<vmem>>, %arg14: memref<104x128xf32, #tpu.memory_space<vmem>>) attributes {dimension_semantics = [#tpu.dimension_semantics<parallel>], iteration_bounds = array<i64: 2>, scalar_prefetch = 0 : i64, scratch_operands = 0 : i64, tpu.core_type = #tpu.core_type<tc>, window_params = [{transform_indices = @transform_0, window_bounds = array<i64: 104, 128>}, {transform_indices = @transform_1, window_bounds = array<i64: 104, 128>}, {transform_indices = @transform_2, window_bounds = array<i64: 104, 1>}, {pipeline_mode = #tpu.pipeline_mode<synchronous>, transform_indices = @transform_3, window_bounds = array<i64: 256, 512>}, {pipeline_mode = #tpu.pipeline_mode<synchronous>, transform_indices = @transform_4, window_bounds = array<i64: 1, 512>}, {pipeline_mode = #tpu.pipeline_mode<synchronous>, transform_indices = @transform_5, window_bounds = array<i64: 128, 256>}, {pipeline_mode = #tpu.pipeline_mode<synchronous>, transform_indices = @transform_6, window_bounds = array<i64: 1, 256>}, {pipeline_mode = #tpu.pipeline_mode<synchronous>, transform_indices = @transform_7, window_bounds = array<i64: 256, 256>}, {pipeline_mode = #tpu.pipeline_mode<synchronous>, transform_indices = @transform_8, window_bounds = array<i64: 1, 256>}, {pipeline_mode = #tpu.pipeline_mode<synchronous>, transform_indices = @transform_9, window_bounds = array<i64: 8, 128>}, {pipeline_mode = #tpu.pipeline_mode<synchronous>, transform_indices = @transform_10, window_bounds = array<i64: 1, 1>}, {transform_indices = @transform_11, window_bounds = array<i64: 1, 8, 104>}, {transform_indices = @transform_12, window_bounds = array<i64: 104, 128>}, {transform_indices = @transform_13, window_bounds = array<i64: 104, 128>}]} {
    %c0 = arith.constant 0 : index
    %c0_0 = arith.constant 0 : index
    %0 = vector.load %arg2[%c0, %c0_0] : memref<104x128xf32, #tpu.memory_space<vmem>>, vector<104x128xf32>
    %c0_1 = arith.constant 0 : index
    %c0_2 = arith.constant 0 : index
    %1 = vector.load %arg3[%c0_1, %c0_2] : memref<104x1xf32, #tpu.memory_space<vmem>>, vector<104x1xf32>
    %2 = vector.broadcast %1 : vector<104x1xf32> to vector<104x128xf32>
    %3 = arith.mulf %0, %2 : vector<104x128xf32>
    %c0_3 = arith.constant 0 : index
    %c0_4 = arith.constant 0 : index
    %4 = vector.load %arg1[%c0_3, %c0_4] : memref<104x128xf32, #tpu.memory_space<vmem>>, vector<104x128xf32>
    %5 = arith.truncf %4 : vector<104x128xf32> to vector<104x128xbf16>
    %6 = arith.truncf %3 : vector<104x128xf32> to vector<104x128xbf16>
    %7 = tpu.concatenate %5, %6 in 1 : vector<104x128xbf16>, vector<104x128xbf16> -> vector<104x256xbf16>
    %c0_5 = arith.constant 0 : index
    %c0_6 = arith.constant 0 : index
    %8 = vector.load %arg4[%c0_5, %c0_6] : memref<256x512xbf16, #tpu.memory_space<vmem>>, vector<256x512xbf16>
    %cst = arith.constant dense<0.000000e+00> : vector<104x512xf32>
    %9 = tpu.matmul %7, %8, %cst {dimension_numbers = #tpu.dot_dimension_numbers<[1], [0], [0], [1], [0, 0, 1, 1], [], []>} : vector<104x256xbf16>, vector<256x512xbf16>, vector<104x512xf32> -> vector<104x512xf32>
    %c0_7 = arith.constant 0 : index
    %c0_8 = arith.constant 0 : index
    %10 = vector.load %arg5[%c0_7, %c0_8] : memref<1x512xf32, #tpu.memory_space<vmem>>, vector<1x512xf32>
    %11 = vector.broadcast %10 : vector<1x512xf32> to vector<104x512xf32>
    %12 = arith.addf %9, %11 : vector<104x512xf32>
    %13 = vector.extract_strided_slice %12 {offsets = [0, 0], sizes = [104, 128], strides = [1, 1]} : vector<104x512xf32> to vector<104x128xf32>
    %14 = arith.negf %13 : vector<104x128xf32>
    %15 = math.exp %14 : vector<104x128xf32>
    %cst_9 = arith.constant 1.000000e+00 : f32
    %16 = vector.broadcast %cst_9 : f32 to vector<104x128xf32>
    %17 = arith.addf %16, %15 : vector<104x128xf32>
    %18 = arith.divf %16, %17 : vector<104x128xf32>
    %19 = vector.extract_strided_slice %12 {offsets = [0, 128], sizes = [104, 128], strides = [1, 1]} : vector<104x512xf32> to vector<104x128xf32>
    %20 = arith.negf %19 : vector<104x128xf32>
    %21 = math.exp %20 : vector<104x128xf32>
    %cst_10 = arith.constant 1.000000e+00 : f32
    %22 = vector.broadcast %cst_10 : f32 to vector<104x128xf32>
    %23 = arith.addf %22, %21 : vector<104x128xf32>
    %24 = arith.divf %22, %23 : vector<104x128xf32>
    %25 = vector.extract_strided_slice %12 {offsets = [0, 256], sizes = [104, 128], strides = [1, 1]} : vector<104x512xf32> to vector<104x128xf32>
    %26 = vector.extract_strided_slice %12 {offsets = [0, 384], sizes = [104, 128], strides = [1, 1]} : vector<104x512xf32> to vector<104x128xf32>
    %27 = arith.mulf %18, %26 : vector<104x128xf32>
    %28 = arith.addf %25, %27 : vector<104x128xf32>
    %29 = math.tanh %28 : vector<104x128xf32>
    %cst_11 = arith.constant 1.000000e+00 : f32
    %30 = vector.broadcast %cst_11 : f32 to vector<104x128xf32>
    %31 = arith.subf %30, %24 : vector<104x128xf32>
    %32 = arith.mulf %31, %29 : vector<104x128xf32>
    %33 = arith.mulf %24, %3 : vector<104x128xf32>
    %34 = arith.addf %32, %33 : vector<104x128xf32>
    %c0_12 = arith.constant 0 : index
    %c0_13 = arith.constant 0 : index
    %35 = vector.load %arg14[%c0_12, %c0_13] : memref<104x128xf32, #tpu.memory_space<vmem>>, vector<104x128xf32>
    tpu.vector_store %arg14[%c0_12, %c0_13], %34 {strides = array<i32>} : memref<104x128xf32, #tpu.memory_space<vmem>>, vector<104x128xf32>,
    %36 = arith.truncf %34 : vector<104x128xf32> to vector<104x128xbf16>
    %c0_14 = arith.constant 0 : index
    %c0_15 = arith.constant 0 : index
    %37 = vector.load %arg6[%c0_14, %c0_15] : memref<128x256xbf16, #tpu.memory_space<vmem>>, vector<128x256xbf16>
    %cst_16 = arith.constant dense<0.000000e+00> : vector<104x256xf32>
    %38 = tpu.matmul %36, %37, %cst_16 {dimension_numbers = #tpu.dot_dimension_numbers<[1], [0], [0], [1], [0, 0, 1, 1], [], []>} : vector<104x128xbf16>, vector<128x256xbf16>, vector<104x256xf32> -> vector<104x256xf32>
    %c0_17 = arith.constant 0 : index
    %c0_18 = arith.constant 0 : index
    %39 = vector.load %arg7[%c0_17, %c0_18] : memref<1x256xf32, #tpu.memory_space<vmem>>, vector<1x256xf32>
    %40 = vector.broadcast %39 : vector<1x256xf32> to vector<104x256xf32>
    %41 = arith.addf %38, %40 : vector<104x256xf32>
    %cst_19 = arith.constant 0.000000e+00 : f32
    %42 = vector.broadcast %cst_19 : f32 to vector<104x256xf32>
    %43 = arith.maximumf %41, %42 : vector<104x256xf32>
    %44 = arith.truncf %43 : vector<104x256xf32> to vector<104x256xbf16>
    %c0_20 = arith.constant 0 : index
    %c0_21 = arith.constant 0 : index
    %45 = vector.load %arg8[%c0_20, %c0_21] : memref<256x256xbf16, #tpu.memory_space<vmem>>, vector<256x256xbf16>
    %cst_22 = arith.constant dense<0.000000e+00> : vector<104x256xf32>
    %46 = tpu.matmul %44, %45, %cst_22 {dimension_numbers = #tpu.dot_dimension_numbers<[1], [0], [0], [1], [0, 0, 1, 1], [], []>} : vector<104x256xbf16>, vector<256x256xbf16>, vector<104x256xf32> -> vector<104x256xf32>
    %c0_23 = arith.constant 0 : index
    %c0_24 = arith.constant 0 : index
    %47 = vector.load %arg9[%c0_23, %c0_24] : memref<1x256xf32, #tpu.memory_space<vmem>>, vector<1x256xf32>
    %48 = vector.broadcast %47 : vector<1x256xf32> to vector<104x256xf32>
    %49 = arith.addf %46, %48 : vector<104x256xf32>
    %cst_25 = arith.constant 0.000000e+00 : f32
    %50 = vector.broadcast %cst_25 : f32 to vector<104x256xf32>
    %51 = arith.maximumf %49, %50 : vector<104x256xf32>
    %52 = vector.extract_strided_slice %51 {offsets = [0, 0], sizes = [104, 128], strides = [1, 1]} : vector<104x256xf32> to vector<104x128xf32>
    %c0_26 = arith.constant 0 : index
    %c0_27 = arith.constant 0 : index
    %53 = vector.load %arg13[%c0_26, %c0_27] : memref<104x128xf32, #tpu.memory_space<vmem>>, vector<104x128xf32>
    tpu.vector_store %arg13[%c0_26, %c0_27], %52 {strides = array<i32>} : memref<104x128xf32, #tpu.memory_space<vmem>>, vector<104x128xf32>,
    %54 = vector.extract_strided_slice %51 {offsets = [0, 128], sizes = [104, 128], strides = [1, 1]} : vector<104x256xf32> to vector<104x128xf32>
    %c0_28 = arith.constant 0 : index
    %c0_29 = arith.constant 0 : index
    %55 = vector.load %arg10[%c0_28, %c0_29] : memref<8x128xbf16, #tpu.memory_space<vmem>>, vector<8x128xbf16>
    %56 = arith.truncf %54 : vector<104x128xf32> to vector<104x128xbf16>
    %57 = tpu.transpose %56, [1, 0] : vector<104x128xbf16> -> vector<128x104xbf16>
    %cst_30 = arith.constant dense<0.000000e+00> : vector<8x104xf32>
    %58 = tpu.matmul %55, %57, %cst_30 {dimension_numbers = #tpu.dot_dimension_numbers<[1], [0], [0], [1], [0, 0, 1, 1], [], []>} : vector<8x128xbf16>, vector<128x104xbf16>, vector<8x104xf32> -> vector<8x104xf32>
    %c0_31 = arith.constant 0 : index
    %c0_32 = arith.constant 0 : index
    %59 = vector.load %arg11[%c0_31, %c0_32] : memref<1x1xf32, #tpu.memory_space<vmem>>, vector<1x1xf32>
    %60 = vector.broadcast %59 : vector<1x1xf32> to vector<8x104xf32>
    %61 = arith.addf %58, %60 : vector<8x104xf32>
    %c0_33 = arith.constant 0 : index
    %c0_34 = arith.constant 0 : index
    %c0_35 = arith.constant 0 : index
    %62 = vector.load %arg12[%c0_33, %c0_34, %c0_35] : memref<1x8x104xf32, #tpu.memory_space<vmem>>, vector<1x8x104xf32>
    %63 = vector.shape_cast %62 : vector<1x8x104xf32> to vector<8x104xf32>
    %64 = vector.shape_cast %61 : vector<8x104xf32> to vector<1x8x104xf32>
    tpu.vector_store %arg12[%c0_33, %c0_34, %c0_35], %64 {strides = array<i32>} : memref<1x8x104xf32, #tpu.memory_space<vmem>>, vector<1x8x104xf32>,
    return
  }
  func.func @transform_0(%arg0: i32) -> (i32, i32) {
    %c0_i32 = arith.constant 0 : i32
    %c0_i32_0 = arith.constant 0 : i32
    return %arg0, %c0_i32 : i32, i32
  }
  func.func @transform_1(%arg0: i32) -> (i32, i32) {
    %c0_i32 = arith.constant 0 : i32
    %c0_i32_0 = arith.constant 0 : i32
    return %arg0, %c0_i32 : i32, i32
  }
  func.func @transform_2(%arg0: i32) -> (i32, i32) {
    %c0_i32 = arith.constant 0 : i32
    %c0_i32_0 = arith.constant 0 : i32
    return %arg0, %c0_i32 : i32, i32
  }
  func.func @transform_3(%arg0: i32) -> (i32, i32) {
    %c0_i32 = arith.constant 0 : i32
    %c0_i32_0 = arith.constant 0 : i32
    %c0_i32_1 = arith.constant 0 : i32
    return %c0_i32, %c0_i32_0 : i32, i32
  }
  func.func @transform_4(%arg0: i32) -> (i32, i32) {
    %c0_i32 = arith.constant 0 : i32
    %c0_i32_0 = arith.constant 0 : i32
    %c0_i32_1 = arith.constant 0 : i32
    return %c0_i32, %c0_i32_0 : i32, i32
  }
  func.func @transform_5(%arg0: i32) -> (i32, i32) {
    %c0_i32 = arith.constant 0 : i32
    %c0_i32_0 = arith.constant 0 : i32
    %c0_i32_1 = arith.constant 0 : i32
    return %c0_i32, %c0_i32_0 : i32, i32
  }
  func.func @transform_6(%arg0: i32) -> (i32, i32) {
    %c0_i32 = arith.constant 0 : i32
    %c0_i32_0 = arith.constant 0 : i32
    %c0_i32_1 = arith.constant 0 : i32
    return %c0_i32, %c0_i32_0 : i32, i32
  }
  func.func @transform_7(%arg0: i32) -> (i32, i32) {
    %c0_i32 = arith.constant 0 : i32
    %c0_i32_0 = arith.constant 0 : i32
    %c0_i32_1 = arith.constant 0 : i32
    return %c0_i32, %c0_i32_0 : i32, i32
  }
  func.func @transform_8(%arg0: i32) -> (i32, i32) {
    %c0_i32 = arith.constant 0 : i32
    %c0_i32_0 = arith.constant 0 : i32
    %c0_i32_1 = arith.constant 0 : i32
    return %c0_i32, %c0_i32_0 : i32, i32
  }
  func.func @transform_9(%arg0: i32) -> (i32, i32) {
    %c0_i32 = arith.constant 0 : i32
    %c0_i32_0 = arith.constant 0 : i32
    %c0_i32_1 = arith.constant 0 : i32
    return %c0_i32, %c0_i32_0 : i32, i32
  }
  func.func @transform_10(%arg0: i32) -> (i32, i32) {
    %c0_i32 = arith.constant 0 : i32
    %c0_i32_0 = arith.constant 0 : i32
    %c0_i32_1 = arith.constant 0 : i32
    return %c0_i32, %c0_i32_0 : i32, i32
  }
  func.func @transform_11(%arg0: i32) -> (i32, i32, i32) {
    %c0_i32 = arith.constant 0 : i32
    %c0_i32_0 = arith.constant 0 : i32
    %c0_i32_1 = arith.constant 0 : i32
    return %arg0, %c0_i32, %c0_i32_0 : i32, i32, i32
  }
  func.func @transform_12(%arg0: i32) -> (i32, i32) {
    %c0_i32 = arith.constant 0 : i32
    %c0_i32_0 = arith.constant 0 : i32
    return %arg0, %c0_i32 : i32, i32
  }
  func.func @transform_13(%arg0: i32) -> (i32, i32) {
    %c0_i32 = arith.constant 0 : i32
    %c0_i32_0 = arith.constant 0 : i32
    return %arg0, %c0_i32 : i32, i32
  }
}

</mosaic_0001>

<bundles_post_ra>
// kernel: squeeze.1
= control target key start
LH: loop header
LB: loop body
LE: loop exit
PB: predicated region body
PF: predicated region fallthrough
CT: control target
= control target key end

     0   :  { %s92_s0 = inlined_call_operand.vmem [shape: f32[2,104], index: 0, kind: input, shape index: {}]   ;;  %s93_s1 = inlined_call_operand.hbm [shape: f32[208], index: 1, kind: output, shape index: {}]  }
   0x1   :  { %v5_v0 = vld [vmem:[%s92_s0] sm:$0x3] }
   0x2   :  { %6 = vst [vmem:[#allocation3] sm:$0x3] %v5_v0 }
   0x3   :  { %2 = vsyncpa [#allocation1], 0  ;;  %vm14_vm0 = vcmask 195584   ;;  %vm8_vm1 = vcmask 850944   ;;  %s65_s0 = smov 104   ;;  %vm18_vm2 = vcmask 654336  }
   0x4   :  { %vm21_vm3 = vcmask 1048384   ;;  %s66_s8 = smov [#allocation0]  }
   0x5   :  { %s33_s9 = sshll.u32 %s66_s8, 4  ;;  %s34_s9 = int_to_ptr.vmem [resolvable:$true] %s33_s9 }
   0x6   :  { %s41_s10 = scalar_lea.vmem %s34_s9, 32  ;;  %p46_p1 = scmp.lt.s32.totalorder %s34_s9, %s34_s9 }
   0x7   :  { %p42_p0 = scmp.ne.s32.totalorder %s34_s9, %s41_s10  ;;  %p47_p2 = scmp.lt.s32.totalorder %s41_s10, %s41_s10 }
   0x9   :  { %v11_v1 = vld [vmem:[#allocation3 + $0x1] sm:$0x1]   ;;  %v7_v3 = vld [vmem:[#allocation3] sm:$0x1]   ;;  %p48_p3 = por %p47_p2, %p46_p1 }
   0xa   :  { %v13_v2 = vld [vmem:[#allocation3 + $0x1] sm:$0x1]   ;;  %9 = vst.msk [vmem:[#allocation2] sm:$0x1] %vm8_vm1, %v7_v3  }
   0xb   :  { %v15_v4 = vsel %vm14_vm0, %v13_v2, %v11_v1  ;;  %p49_p4 = pnand %p48_p3, %p42_p0 }
   0xc   :  { %16 = vrot.lane.b32.xlu0 %v15_v4, %s65_s0 }
  0x7e   :  { %v17_v5 = vpop.permute.xlu0 %16  }
  0x7f   :  { %20 = vst.msk [vmem:[#allocation2 + $0x1] sm:$0x1] %vm18_vm2, %v17_v5  }
  0x80   :  { %22 = vst.msk [vmem:[#allocation2] sm:$0x1] %vm21_vm3, %v17_v5  }
  0x87   :  { %v26_v6 = vld [vmem:[#allocation2] sm:$0x3] }
  0x88   :  { %28 = vst [vmem:[#allocation0] sm:$0x3] %v26_v6 }
  0x89   :  { %52 = shalt.err (!%p49_p4)
}
  0x8a   :  { %s53_s13 = scalar_lea.hbm %s93_s1, 32 }
  0x8b   :  { %p54_p5 = scmp.ne.s32.totalorder %s93_s1, %s53_s13  ;;  %p57_p6 = scmp.lt.u32.totalorder %s53_s13, %s93_s1 }
  0x8d   :  { %p59_p7 = pnand %p57_p6, %p54_p5 }
  0x8f   :  { %62 = shalt.err (!%p59_p7)
}
  0x90   :  { %36 = dma.vmem_to_hbm [thread:$0]  %s34_s9, 32, %s93_s1, [#allocation1]  }
  0x91   :  { %63 = dma.done.wait [#allocation1], 32  }
  0x92   :  { %64 = vsyncadd [#allocation1], 4294967264 }
  0x93   :  { %38 = vsyncpa [#allocation1], 1 }

// kernel: mlpbase_forward.1
= control target key start
LH: loop header
LB: loop body
LE: loop exit
PB: predicated region body
PF: predicated region fallthrough
CT: control target
= control target key end

     0   :  { %s4159_s0 = inlined_call_operand.vmem [shape: f32[200,128], index: 0, kind: input, shape index: {}]   ;;  %s4160_s1 = inlined_call_operand.hbm [shape: f32[200,128], index: 1, kind: input, shape index: {}]   ;;  %s4161_s2 = inlined_call_operand.vmem [shape: f32[200,1], index: 2, kind: input, shape index: {}]   ;;  %s4162_s3 = inlined_call_operand.hbm [shape: bf16[256,512], index: 3, kind: input, shape index: {}]   ;;  %s4163_s4 = inlined_call_operand.vmem [shape: f32[1,512], index: 4, kind: input, shape index: {}]   ;;  %s4164_s5 = inlined_call_operand.hbm [shape: bf16[128,256], index: 5, kind: input, shape index: {}]   ;;  %s4165_s6 = inlined_call_operand.vmem [shape: f32[1,256], index: 6, kind: input, shape index: {}]   ;;  %s4166_s7 = inlined_call_operand.hbm [shape: bf16[256,256], index: 7, kind: input, shape index: {}]   ;;  %s4167_s8 = inlined_call_operand.vmem [shape: f32[1,256], index: 8, kind: input, shape index: {}]   ;;  %s4168_s9 = inlined_call_operand.vmem [shape: bf16[8,128], index: 9, kind: input, shape index: {}]   ;;  %s4169_s10 = inlined_call_operand.<no memory space> [shape: f32[1,1], index: 10, kind: input, shape index: {}]   ;;  %s4170_s11 = inlined_call_operand.vmem [shape: f32[2,8,104], index: 11, kind: output, shape index: {0}]   ;;  %s4171_s12 = inlined_call_operand.hbm [shape: f32[200,128], index: 12, kind: output, shape index: {1}]   ;;  %s4172_s13 = inlined_call_operand.hbm [shape: f32[200,128], index: 13, kind: output, shape index: {2}]  }
   0x1   :  { %4185 = sst [smem:[#allocation24_spill]] %s4162_s3  ;;  %v19_v0 = vstv %s4169_s10 }
   0x2   :  { %4186 = sst [smem:[#allocation25_spill]] %s4168_s9  ;;  %20 = vst [vmem:[#allocation2] sm:$0x1] %v19_v0 }
   0x3   :  { %4187 = sst [smem:[#allocation26_spill]] %s4170_s11 }
   0x4   :  { %4188 = sst [smem:[#allocation27_spill]] %s4171_s12 }
   0x5   :  { %4189 = sst [smem:[#allocation28_spill]] %s4172_s13 }
   0x6   :  { %21 = vsyncpa [#allocation4], 0 }
   0x7   :  { %23 = vsyncpa [#allocation4 + $0x1], 0 }
   0x8   :  { %24 = vsyncpa [#allocation7], 0 }
   0x9   :  { %25 = vsyncpa [#allocation10], 0 }
   0xa   :  { %26 = vsyncpa [#allocation5], 0 }
   0xb   :  { %28 = vsyncpa [#allocation5 + $0x1], 0 }
   0xc   :  { %29 = vsyncpa [#allocation13], 0 }
   0xd   :  { %31 = vsyncpa [#allocation13 + $0x1], 0  ;;  %s3426_s27 = smov 0   ;;  %s3428_s28 = smov 0  }
   0xe   :  { %s3430_s29 = smov 0   ;;  %s3432_s30 = smov 0  }
   0xf LB: > { %4190 = sst [smem:[#allocation19_spill]] %s3320_s27  ;;  %s3447_s10 = sadd.s32 4294967295, %s3332_s30   ;;  %s3332_s30 = sphi %s3432_s30, %s4222_s30   ;;  %s3328_s29 = sphi %s3430_s29, %s4226_s29   ;;  %s3324_s28 = sphi %s3428_s28, %s4225_s28   ;;  %s3320_s27 = sphi %s3426_s27, %s4224_s27  }
  0x10   : > { %s2527_s14 = sadd.s32 4294967294, %s3332_s30   ;;  %s3451_s15 = sadd.s32 1, %s3332_s30  }
  0x11   : > { %4191 = sst [smem:[#allocation20_spill]] %s3451_s15  ;;  %s70_s16 = sadd.s32 1, %s3328_s29 }
  0x12   : > { %s67_s17 = ssub.s32 %s3332_s30, %s3451_s15  ;;  %p77_p0 = scmp.ne.s32.totalorder %s3328_s29, %s3324_s28 }
  0x13   : > { %p68_p1 = scmp.eq.s32.totalorder %s67_s17, 0  ;;  %p78_p2 = scmp.eq.s32.totalorder %s3332_s30, 0 }
  0x14   : > { %p83_p3 = scmp.ne.s32.totalorder %s3324_s28, %s3320_s27  ;;  %p4178_p4 = scmp.eq.s32.totalorder %s3447_s10, 0 }
  0x15   : > { %s3463_s18 = scalar_select %p68_p1, %s3328_s29, %s70_s16  }
  0x16   : > { %p3465_p5 = por %p78_p2, %p77_p0  ;;  %p3471_p6 = por %p4178_p4, %p83_p3 }
  0x17   : > { %4192 = sst [smem:[#allocation21_spill]] %s3463_s18  ;;  %p327_p7 = scmp.eq.s32.totalorder %s3447_s10, 1 }
  0x18   : > { %s4193_s19 = scalar_select %p3465_p5, 1, 0 }
  0x19   : > { %s4194_s20 = scalar_select %p3471_p6, 1, 0 }
  0x1a   : > { %p333_p8 = scmp.eq.s32.totalorder %s2527_s14, 1  ;;  %p2528_p9 = scmp.ge.s32.totalorder %s3332_s30, 1 }
  0x1b   : > { %p366_p10 = scmp.lt.s32.totalorder %s3332_s30, 3  ;;  %p3478_p11 = por %p327_p7, %p77_p0 }
  0x1c   : > { %p3482_p12 = por %p333_p8, %p83_p3  ;;  %s3334_s24 = smov [#allocation6]  }
  0x1d   : > { %s4195_s21 = scalar_select %p3478_p11, 1, 0 }
  0x1e   : > { %s4197_s22 = scalar_select %p3482_p12, 1, 0 }
  0x1f   : > { %4196 = sst [smem:[#allocation22_spill]] %s4195_s21  ;;  %p3486_p13 = pnand %p2528_p9, %p366_p10 }
  0x20   : > { %4198 = sst [smem:[#allocation23_spill]] %s4197_s22  ;;  %s378_s25 = sshll.u32 %s3334_s24, 4  ;;  %s379_s25 = int_to_ptr.vmem [resolvable:$true] %s378_s25 }
  0x21   : > { %s4199_s23 = scalar_select %p3486_p13, 1, 0 }
  0x22   : > { %p2742_p1 = pneg %p3486_p13  ;;  %s3335_s14 = smov [#allocation8]  }
  0x23   : > { %s394_s16 = sshll.u32 %s3335_s14, 4  ;;  %s4201_s3 = sld [smem:[#allocation24_spill]]  ;;  %s3498_s16 = int_to_ptr.vmem [resolvable:$true] %s394_s16 }
  0x24   : > { %p3494_p2 = pnand %p2742_p1, %p4178_p4 }
  0x26   : > { %p3508_p3 = pneg %p3494_p2 }
  0x29   : > { %s3114_s15 = scalar_lea.hbm %s4201_s3, 8192 }
  0x2a   : > { %p3115_p0 = scmp.ne.s32.totalorder %s4201_s3, %s3114_s15  ;;  %p3121_p9 = scmp.lt.u32.totalorder %s3114_s15, %s4201_s3 }
  0x2c   : > { %p3117_p7 = pnand %p3508_p3, %p3115_p0 }
  0x2e   : > { %p3118_p8 = pneg %p3117_p7 }
  0x30   : > { %p3123_p10 = pnand %p3121_p9, %p3118_p8 }
  0x32   : > { %3126 = shalt.err (!%p3123_p10)
}
  0x33   : > { %s3127_s18 = scalar_lea.vmem %s379_s25, 8192  ;;  %p3135_p11 = scmp.lt.s32.totalorder %s379_s25, %s379_s25 }
  0x34   : > { %p3128_p1 = scmp.ne.s32.totalorder %s379_s25, %s3127_s18  ;;  %p3136_p6 = scmp.lt.s32.totalorder %s3127_s18, %s3127_s18 }
  0x36   : > { %p3130_p4 = pnand %p3128_p1, %p3508_p3  ;;  %p3137_p13 = por %p3136_p6, %p3135_p11 }
  0x38   : > { %p3131_p12 = pneg %p3130_p4 }
  0x3a   : > { %p3138_p5 = pnand %p3137_p13, %p3131_p12 }
  0x3c   : > { %3141 = shalt.err (!%p3138_p5)
}
  0x3d   : > { %s3336_s27 = smov 256   ;;  %s3337_s22 = smov 16  }
  0x3e   : > { %2745 = dma.hbm_to_vmem [thread:$0]  (!%p3494_p2), %s4201_s3, 8192, %s379_s25, [#allocation7], %s3336_s27, %s3336_s27, %s3337_s22  }
  0x3f   : > { %s3142_s12 = scalar_lea.hbm %s4164_s5, 2048 }
  0x40   : > { %p3143_p4 = scmp.ne.s32.totalorder %s4164_s5, %s3142_s12  ;;  %p3149_p11 = scmp.lt.u32.totalorder %s3142_s12, %s4164_s5 }
  0x42   : > { %p3145_p6 = pnand %p3143_p4, %p3508_p3 }
  0x44   : > { %p3146_p5 = pneg %p3145_p6 }
  0x46   : > { %p3151_p12 = pnand %p3149_p11, %p3146_p5 }
  0x48   : > { %3154 = shalt.err (!%p3151_p12)
}
  0x49   : > { %s3155_s25 = scalar_lea.vmem %s3498_s16, 2048  ;;  %p3163_p8 = scmp.lt.s32.totalorder %s3498_s16, %s3498_s16 }
  0x4a   : > { %p3156_p13 = scmp.ne.s32.totalorder %s3498_s16, %s3155_s25  ;;  %p3164_p9 = scmp.lt.s32.totalorder %s3155_s25, %s3155_s25 }
  0x4c   : > { %p3158_p0 = pnand %p3156_p13, %p3508_p3  ;;  %p3165_p10 = por %p3164_p9, %p3163_p8 }
  0x4e   : > { %p3159_p7 = pneg %p3158_p0 }
  0x50   : > { %p3166_p1 = pnand %p3165_p10, %p3159_p7 }
  0x52   : > { %3169 = shalt.err (!%p3166_p1)
}
  0x53   : > { %s3338_s11 = smov 128   ;;  %s3339_s9 = smov 8  }
  0x54   : > { %2748 = dma.hbm_to_vmem [thread:$0]  (!%p3494_p2), %s4164_s5, 2048, %s3498_s16, [#allocation7], %s3338_s11, %s3338_s11, %s3339_s9  }
  0x55   : > { %s3340_s27 = smov [#allocation9]   ;;  %s3170_s17 = scalar_lea.hbm %s4166_s7, 4096 }
  0x56   : > { %s410_s22 = sshll.u32 %s3340_s27, 4  ;;  %p3171_p4 = scmp.ne.s32.totalorder %s4166_s7, %s3170_s17  ;;  %s411_s22 = int_to_ptr.vmem [resolvable:$true] %s410_s22 }
  0x57   : > { %p3177_p11 = scmp.lt.u32.totalorder %s3170_s17, %s4166_s7 }
  0x58   : > { %p3173_p6 = pnand %p3171_p4, %p3508_p3 }
  0x5a   : > { %p3174_p5 = pneg %p3173_p6 }
  0x5c   : > { %p3179_p12 = pnand %p3177_p11, %p3174_p5 }
  0x5e   : > { %3182 = shalt.err (!%p3179_p12)
}
  0x5f   : > { %s3183_s16 = scalar_lea.vmem %s411_s22, 4096  ;;  %p3191_p8 = scmp.lt.s32.totalorder %s411_s22, %s411_s22 }
  0x60   : > { %p3184_p13 = scmp.ne.s32.totalorder %s411_s22, %s3183_s16  ;;  %p3192_p9 = scmp.lt.s32.totalorder %s3183_s16, %s3183_s16 }
  0x62   : > { %p3186_p0 = pnand %p3184_p13, %p3508_p3  ;;  %p3193_p10 = por %p3192_p9, %p3191_p8 }
  0x64   : > { %p3187_p7 = pneg %p3186_p0 }
  0x66   : > { %p3194_p1 = pnand %p3193_p10, %p3187_p7 }
  0x68   : > { %3197 = shalt.err (!%p3194_p1)
}
  0x69   : > { %2751 = dma.hbm_to_vmem [thread:$0]  (!%p3494_p2), %s4166_s7, 4096, %s411_s22, [#allocation10], %s3338_s11, %s3338_s11, %s3339_s9  }
  0x6a   : > { %p2532_p4 = scmp.ge.s32.totalorder %s3332_s30, 2 }
  0x6b   : > { %p4203_p6 = scmp.ne.s32.totalorder (!%p2532_p4), %s4193_s19, 0 }
  0x6c   : > { %429 = sbr.rel (%p2532_p4) target bundleno = 150 (0x96), region = 48 }
  0x73   : > { %449 = sbr.rel (!%p4203_p6) target bundleno = 150 (0x96), region = 56  ;;  %s450_s3 = sand.u32 (%p4203_p6), 1, %s3328_s29  }
  0x74   : > { %s455_s24 = smul.u32 (%p4203_p6), 13, %s3332_s30  ;;  %s3575_s9 = scalar_lea.sflag (%p4203_p6), [#allocation4], %s450_s3 }
  0x75   : > { %s2725_s27 = smul.u32 (%p4203_p6), 104, %s450_s3 }
  0x76   : > { %s456_s13 = ssub.s32 (%p4203_p6), 25, %s455_s24 }
  0x77   : > { %p457_p3 = scmp.lt.s32.totalorder (%p4203_p6), %s456_s13, 13  ;;  %s454_s22 = scalar_lea.vmem (%p4203_p6), [#allocation3], %s2725_s27 }
  0x7a   : > { %s4228_s13 = smov (!%p457_p3, %s456_s13), 13 }
  0x7b   : > { %s3572_s26 = sshll.u32 %s4228_s13, 7 }
  0x7c   : > { %s461_s11 = ssub.s32 1664, %s3572_s26 }
  0x7d   : > { %462 = vsyncadd %s3575_s9, %s461_s11  ;;  %p2534_p2 = scmp.ne.s32.totalorder %s3572_s26, 0  ;;  %s2696_s19 = smul.u32 1664, %s3332_s30 }
  0x7e   : > { %s467_s15 = sshll.u32 %s454_s22, 4  ;;  %s3202_s21 = scalar_lea.hbm %s4160_s1, 3200  ;;  %s3585_s15 = int_to_ptr.vmem [resolvable:$true] %s467_s15 }
  0x7f   : > { %s3583_s18 = scalar_lea.hbm %s4160_s1, %s2696_s19 }
  0x80   : > { %s3198_s25 = scalar_lea.hbm %s3583_s18, %s3572_s26  ;;  %p3203_p13 = scmp.lt.u32.totalorder %s3583_s18, %s4160_s1 }
  0x81   : > { %p3199_p5 = scmp.ne.s32.totalorder %s3583_s18, %s3198_s25  ;;  %p3204_p0 = scmp.lt.u32.totalorder %s3202_s21, %s3198_s25 }
  0x82   : > { %p3206_p8 = scmp.lt.u32.totalorder %s3198_s25, %s3583_s18 }
  0x83   : > { %p3200_p11 = pnand %p3199_p5, %p2534_p2  ;;  %p3205_p7 = por %p3204_p0, %p3203_p13 }
  0x85   : > { %p3201_p12 = pneg %p3200_p11  ;;  %p3207_p9 = por %p3206_p8, %p3205_p7 }
  0x87   : > { %p3208_p10 = pnand %p3207_p9, %p3201_p12 }
  0x89   : > { %3211 = shalt.err (!%p3208_p10)
}
  0x8a   : > { %s3212_s27 = scalar_lea.vmem %s3585_s15, %s3572_s26  ;;  %s3341_s13 = smov [#allocation3]  }
  0x8b   : > { %p3213_p1 = scmp.ne.s32.totalorder %s3585_s15, %s3212_s27  ;;  %s3216_s11 = sshll.u32 %s3341_s13, 4  ;;  %s3217_s11 = int_to_ptr.vmem [resolvable:$false] %s3216_s11 }
  0x8c   : > { %s3218_s22 = scalar_lea.vmem %s3217_s11, 3328  ;;  %p3219_p5 = scmp.lt.s32.totalorder %s3585_s15, %s3217_s11 }
  0x8d   : > { %p3214_p6 = pnand %p3213_p1, %p2534_p2  ;;  %p3220_p11 = scmp.lt.s32.totalorder %s3218_s22, %s3212_s27 }
  0x8f   : > { %p3215_p3 = pneg %p3214_p6  ;;  %p3221_p13 = por %p3220_p11, %p3219_p5 }
  0x91   : > { %p3222_p0 = pnand %p3221_p13, %p3215_p3 }
  0x93   : > { %3225 = shalt.err (!%p3222_p0)
}
  0x94   : > { %s3342_s19 = smov 128   ;;  %s3343_s17 = smov 8  }
  0x95   : > { %473 = dma.hbm_to_vmem [thread:$0]  (%p2534_p2), %s3583_s18, %s3572_s26, %s3585_s15, %s3575_s9, %s3342_s19, %s3342_s19, %s3343_s17  }
  0x96 PF: > { %p4204_p12 = scmp.ne.s32.totalorder %s4199_s23, 0 }
  0x97   : > { %s3615_s14 = sand.u32 (!%p4204_p12), 1, %s3324_s28   ;;  %p4205_p7 = scmp.ne.s32.totalorder (!%p4204_p12), %s4194_s20, 0 }
  0x98   : > { %496 = sbr.rel (%p4204_p12) target bundleno = 1373 (0x55d), region = 64  ;;  %s499_s16 = scalar_lea.sflag (!%p4204_p12), [#allocation4], %s3615_s14 }
  0x99   : > { %s3618_s25 = smul.u32 (!%p4204_p12), 104, %s3615_s14 }
  0x9b   : > { %s3622_s12 = scalar_lea.vmem (!%p4204_p12), [#allocation3], %s3618_s25 }
  0x9f   : > { %3299 = dma.done.wait (%p4205_p7), %s499_s16, 1664  }
  0xa0   : > { %3301 = vsyncadd (%p4205_p7), %s499_s16, 4294965632  ;;  %p4206_p2 = scmp.eq.s32.totalorder %s3447_s10, 0 }
  0xa2   : > { %3303 = dma.done.wait (%p4206_p2), [#allocation7], 10240   ;;  %p4207_p8 = pmov %p4206_p2 }
  0xa3   : > { %p4208_p9 = pmov %p4206_p2 }
  0xa4   : > { %3305 = vsyncadd (%p4207_p8), [#allocation7], 4294957056 }
  0xa5   : > { %3307 = dma.done.wait (%p4208_p9), [#allocation10], 4096   ;;  %p4209_p10 = pmov %p4206_p2 }
  0xa6   : > { %s3637_s23 = smul.u32 13, %s3447_s10  ;;  %v4183_v1 = vmov 0   ;;  %v2816_v8 = vld [vmem:[#allocation6 + $0x4] ss:$16 sps:$4 sm:$0xff]   ;;  %v2818_v9 = vld [vmem:[#allocation6 + $0xc] ss:$16 sps:$4 sm:$0xff]  }
  0xa7   : > { %3309 = vsyncadd (%p4209_p10), [#allocation10], 4294963200  ;;  %2815 = vset.pattern.permute.xlu1 %v4183_v1  ;;  %2814 = vset.pattern.permute.xlu0 %v4183_v1  ;;  %v2820_v10 = vld [vmem:[#allocation6] ss:$16 sps:$4 sm:$0xff]   ;;  %v2821_v11 = vld [vmem:[#allocation6 + $0x8] ss:$16 sps:$4 sm:$0xff]  }
  0xa8   : > { %p589_p1 = scmp.lt.s32.totalorder %s3637_s23, 24  ;;  %1169 = vmatprep.subr.bf16.mxu0 %v2816_v8  ;;  %1270 = vmatprep.subr.bf16.mxu1 %v2818_v9  ;;  %v2822_v12 = vld [vmem:[#allocation6 + $0x24] ss:$16 sps:$4 sm:$0xff]   ;;  %v2824_v15 = vld [vmem:[#allocation6 + $0x2c] ss:$16 sps:$4 sm:$0xff]   ;;  %s3880_s11 = scalar_lea.vmem [#allocation12], %s3618_s25 }
  0xa9   : > { %1170 = vmatpush1.bf16.msra.mxu0 %v2820_v10  ;;  %1271 = vmatpush1.bf16.msra.mxu1 %v2821_v11  ;;  %v2826_v16 = vld [vmem:[#allocation6 + $0x20] ss:$16 sps:$4 sm:$0xff]   ;;  %v2827_v17 = vld [vmem:[#allocation6 + $0x28] ss:$16 sps:$4 sm:$0xff]   ;;  %v2828_v18 = vld [vmem:[#allocation6 + $0x44] ss:$16 sps:$4 sm:$0xff]  }
  0xaa   : > { %s3643_s20 = scalar_select %p589_p1, %s3637_s23, 24  ;;  %1171 = vmatprep.subr.bf16.mxu0 %v2822_v12  ;;  %1272 = vmatprep.subr.bf16.mxu1 %v2824_v15  ;;  %v2830_v19 = vld [vmem:[#allocation6 + $0x4c] ss:$16 sps:$4 sm:$0xff]   ;;  %v2832_v20 = vld [vmem:[#allocation6 + $0x40] ss:$16 sps:$4 sm:$0xff]   ;;  %vm3346_vm0 = vmmov 0  }
  0xab   : > { %v2833_v21 = vld [vmem:[#allocation6 + $0x48] ss:$16 sps:$4 sm:$0xff]   ;;  %v2834_v22 = vld [vmem:[#allocation6 + $0x64] ss:$16 sps:$4 sm:$0xff]   ;;  %v2836_v25 = vld [vmem:[#allocation6 + $0x6c] ss:$16 sps:$4 sm:$0xff]  }
  0xac   : > { %s2542_s26 = sshll.u32 %s3643_s20, 3  ;;  %v2838_v26 = vld [vmem:[#allocation6 + $0x60] ss:$16 sps:$4 sm:$0xff]   ;;  %v2839_v28 = vld [vmem:[#allocation6 + $0x68] ss:$16 sps:$4 sm:$0xff]   ;;  %p617_p6 = scmp.lt.s32.totalorder %s3447_s10, 1 }
  0xad   : > { %s3651_s18 = scalar_lea.vmem %s4161_s2, %s2542_s26  ;;  %1172 = vmatpush1.bf16.msra.mxu0 %v2826_v16  ;;  %1273 = vmatpush1.bf16.msra.mxu1 %v2827_v17  ;;  %v2840_v29 = vld [vmem:[#allocation6 + $0x84] ss:$16 sps:$4 sm:$0xff]   ;;  %v2842_v31 = vld [vmem:[#allocation6 + $0x8c] ss:$16 sps:$4 sm:$0xff]   ;;  %v2844_v32 = vld [vmem:[#allocation6 + $0x80] ss:$16 sps:$4 sm:$0xff]   ;;  %s3671_s24 = scalar_lea.vmem %s4159_s0, %s2542_s26 }
  0xae   : > { %v647_v2 = vld [vmem:[%s3651_s18 + $0x10] sm:$0xff]  ;;  %v645_v3 = vld [vmem:[%s3651_s18] sm:$0xff]  ;;  %v648_v4 = vld [vmem:[%s3651_s18 + $0x18] sm:$0xff]  ;;  %1173 = vmatprep.subr.bf16.mxu0 %v2828_v18  ;;  %1274 = vmatprep.subr.bf16.mxu1 %v2830_v19  ;;  %s4211_s26 = sld [smem:[#allocation25_spill]]  ;;  %s4212_s3 = sld [smem:[#allocation26_spill]]  ;;  %vm2289_vm1 = vcmask 850944  }
  0xaf   : > { %670 = vperm.xlu1 %2815, %v647_v2   ;;  %660 = vperm.xlu0 %2814, %v645_v3   ;;  %v646_v5 = vld [vmem:[%s3651_s18 + $0x8] sm:$0xff]  ;;  %v649_v7 = vld [vmem:[%s3651_s18 + $0x20] sm:$0xff]  ;;  %v652_v13 = vld [vmem:[%s3651_s18 + $0x38] sm:$0xff]  ;;  %s618_s9 = scalar_select %p617_p6, %s3447_s10, 1 }
  0xb0   : > { %v650_v6 = vld [vmem:[%s3651_s18 + $0x28] sm:$0xff]  ;;  %v651_v14 = vld [vmem:[%s3651_s18 + $0x30] sm:$0xff]  ;;  %v653_v24 = vld [vmem:[%s3651_s18 + $0x40] sm:$0xff]  ;;  %s2296_s27 = scalar_lea.sflag [#allocation5], %s3615_s14  ;;  %s2301_s13 = scalar_lea.sflag [#allocation13], %s3615_s14 }
  0xb1   : > { %v654_v23 = vld [vmem:[%s3651_s18 + $0x48] sm:$0xff]  ;;  %1174 = vmatpush1.bf16.msra.mxu0 %v2832_v20  ;;  %v656_v27 = vld [vmem:[%s3651_s18 + $0x58] sm:$0xff]  ;;  %1275 = vmatpush1.bf16.msra.mxu1 %v2833_v21  ;;  %v655_v30 = vld [vmem:[%s3651_s18 + $0x50] sm:$0xff]  ;;  %s2544_s15 = sshll.u32 %s618_s9, 3  ;;  %s4213_s22 = sld [smem:[#allocation22_spill]] }
  0xb2   : > { %1175 = vmatprep.subr.bf16.mxu0 %v2834_v22  ;;  %1276 = vmatprep.subr.bf16.mxu1 %v2836_v25  ;;  %v2845_v33 = vld [vmem:[#allocation6 + $0x88] ss:$16 sps:$4 sm:$0xff]   ;;  %v2846_v34 = vld [vmem:[#allocation6 + $0xa4] ss:$16 sps:$4 sm:$0xff]   ;;  %v2683_v35 = vld [vmem:[#allocation2] ss:$0 sm:$0xff] }
  0xb3   : > { %675 = vperm.xlu1 %2815, %v648_v4   ;;  %665 = vperm.xlu0 %2814, %v646_v5   ;;  %v657_v36 = vld [vmem:[%s3651_s18 + $0x60] sm:$0xff]  ;;  %v2851_v39 = vld [vmem:[#allocation6 + $0xa8] ss:$16 sps:$4 sm:$0xff]  }
  0xb4   : > { %v2848_v37 = vld [vmem:[#allocation6 + $0xac] ss:$16 sps:$4 sm:$0xff]   ;;  %v2850_v38 = vld [vmem:[#allocation6 + $0xa0] ss:$16 sps:$4 sm:$0xff]   ;;  %v2852_v40 = vld [vmem:[#allocation6 + $0xc4] ss:$16 sps:$4 sm:$0xff]  }
  0xb5   : > { %1176 = vmatpush1.bf16.msra.mxu0 %v2838_v26  ;;  %1277 = vmatpush1.bf16.msra.mxu1 %v2839_v28  ;;  %v2854_v41 = vld [vmem:[#allocation6 + $0xcc] ss:$16 sps:$4 sm:$0xff]   ;;  %v2856_v42 = vld [vmem:[#allocation6 + $0xc0] ss:$16 sps:$4 sm:$0xff]   ;;  %v2857_v43 = vld [vmem:[#allocation6 + $0xc8] ss:$16 sps:$4 sm:$0xff]  }
  0xb6   : > { %1177 = vmatprep.subr.bf16.mxu0 %v2840_v29  ;;  %1278 = vmatprep.subr.bf16.mxu1 %v2842_v31  ;;  %v2858_v44 = vld [vmem:[#allocation6 + $0xe4] ss:$16 sps:$4 sm:$0xff]   ;;  %v2860_v45 = vld [vmem:[#allocation6 + $0xec] ss:$16 sps:$4 sm:$0xff]   ;;  %v2862_v46 = vld [vmem:[#allocation6 + $0xe0] ss:$16 sps:$4 sm:$0xff]  }
  0xb7   : > { %685 = vperm.xlu1 %2815, %v650_v6   ;;  %680 = vperm.xlu0 %2814, %v649_v7   ;;  %v2863_v47 = vld [vmem:[#allocation6 + $0xe8] ss:$16 sps:$4 sm:$0xff]   ;;  %v2864_v48 = vld [vmem:[#allocation6 + $0x104] ss:$16 sps:$4 sm:$0xff]   ;;  %v2866_v49 = vld [vmem:[#allocation6 + $0x10c] ss:$16 sps:$4 sm:$0xff]  }
  0xb8   : > { %v2868_v50 = vld [vmem:[#allocation6 + $0x100] ss:$16 sps:$4 sm:$0xff]   ;;  %v2869_v51 = vld [vmem:[#allocation6 + $0x108] ss:$16 sps:$4 sm:$0xff]   ;;  %v2870_v52 = vld [vmem:[#allocation6 + $0x124] ss:$16 sps:$4 sm:$0xff]  }
  0xb9   : > { %1178 = vmatpush1.bf16.msra.mxu0 %v2844_v32  ;;  %1279 = vmatpush1.bf16.msra.mxu1 %v2845_v33  ;;  %v2872_v53 = vld [vmem:[#allocation6 + $0x12c] ss:$16 sps:$4 sm:$0xff]   ;;  %v2874_v54 = vld [vmem:[#allocation6 + $0x120] ss:$16 sps:$4 sm:$0xff]   ;;  %v2875_v55 = vld [vmem:[#allocation6 + $0x128] ss:$16 sps:$4 sm:$0xff]  }
  0xba   : > { %1179 = vmatprep.subr.bf16.mxu0 %v2846_v34  ;;  %1280 = vmatprep.subr.bf16.mxu1 %v2848_v37  ;;  %v2876_v56 = vld [vmem:[#allocation6 + $0x144] ss:$16 sps:$4 sm:$0xff]   ;;  %v2878_v57 = vld [vmem:[#allocation6 + $0x14c] ss:$16 sps:$4 sm:$0xff]   ;;  %v2880_v58 = vld [vmem:[#allocation6 + $0x140] ss:$16 sps:$4 sm:$0xff]  }
  0xbb   : > { %695 = vperm.xlu1 %2815, %v652_v13   ;;  %690 = vperm.xlu0 %2814, %v651_v14   ;;  %v2881_v59 = vld [vmem:[#allocation6 + $0x148] ss:$16 sps:$4 sm:$0xff]   ;;  %v2882_v60 = vld [vmem:[#allocation6 + $0x164] ss:$16 sps:$4 sm:$0xff]   ;;  %v2884_v61 = vld [vmem:[#allocation6 + $0x16c] ss:$16 sps:$4 sm:$0xff]  }
  0xbc   : > { %v2886_v62 = vld [vmem:[#allocation6 + $0x160] ss:$16 sps:$4 sm:$0xff]   ;;  %v2887_v63 = vld [vmem:[#allocation6 + $0x168] ss:$16 sps:$4 sm:$0xff]   ;;  %v2888_v0 = vld [vmem:[#allocation6 + $0x184] ss:$16 sps:$4 sm:$0xff]  }
  0xbd   : > { %1180 = vmatpush1.bf16.msra.mxu0 %v2850_v38  ;;  %1281 = vmatpush1.bf16.msra.mxu1 %v2851_v39  ;;  %v2890_v2 = vld [vmem:[#allocation6 + $0x18c] ss:$16 sps:$4 sm:$0xff]   ;;  %v2892_v3 = vld [vmem:[#allocation6 + $0x180] ss:$16 sps:$4 sm:$0xff]   ;;  %v2893_v4 = vld [vmem:[#allocation6 + $0x188] ss:$16 sps:$4 sm:$0xff]  }
  0xbe   : > { %1181 = vmatprep.subr.bf16.mxu0 %v2852_v40  ;;  %1282 = vmatprep.subr.bf16.mxu1 %v2854_v41  ;;  %v2894_v5 = vld [vmem:[#allocation6 + $0x1a4] ss:$16 sps:$4 sm:$0xff]   ;;  %v2896_v6 = vld [vmem:[#allocation6 + $0x1ac] ss:$16 sps:$4 sm:$0xff]   ;;  %v2898_v7 = vld [vmem:[#allocation6 + $0x1a0] ss:$16 sps:$4 sm:$0xff]  }
  0xbf   : > { %705 = vperm.xlu1 %2815, %v654_v23   ;;  %700 = vperm.xlu0 %2814, %v653_v24   ;;  %v2899_v8 = vld [vmem:[#allocation6 + $0x1a8] ss:$16 sps:$4 sm:$0xff]   ;;  %v2900_v9 = vld [vmem:[#allocation6 + $0x1c4] ss:$16 sps:$4 sm:$0xff]   ;;  %v2902_v10 = vld [vmem:[#allocation6 + $0x1cc] ss:$16 sps:$4 sm:$0xff]  }
  0xc0   : > { %v2904_v11 = vld [vmem:[#allocation6 + $0x1c0] ss:$16 sps:$4 sm:$0xff]   ;;  %v2905_v12 = vld [vmem:[#allocation6 + $0x1c8] ss:$16 sps:$4 sm:$0xff]   ;;  %v2906_v13 = vld [vmem:[#allocation6 + $0x1e4] ss:$16 sps:$4 sm:$0xff]  }
  0xc1   : > { %1182 = vmatpush1.bf16.msra.mxu0 %v2856_v42  ;;  %1283 = vmatpush1.bf16.msra.mxu1 %v2857_v43  ;;  %v2908_v14 = vld [vmem:[#allocation6 + $0x1ec] ss:$16 sps:$4 sm:$0xff]   ;;  %v2910_v15 = vld [vmem:[#allocation6 + $0x1e0] ss:$16 sps:$4 sm:$0xff]   ;;  %v2911_v16 = vld [vmem:[#allocation6 + $0x1e8] ss:$16 sps:$4 sm:$0xff]  }
  0xc2   : > { %1183 = vmatprep.subr.bf16.mxu0 %v2858_v44  ;;  %1284 = vmatprep.subr.bf16.mxu1 %v2860_v45  ;;  %v2914_v17 = vld [vmem:[#allocation8 + $0x4] ss:$8 sps:$4 sm:$0xff]   ;;  %v632_v21 = vld [vmem:[%s3622_s12] sm:$0xff]  ;;  %p4214_p3 = scmp.ne.s32.totalorder %s4213_s22, 0 }
  0xc3   : > { %715 = vperm.xlu1 %2815, %v656_v27   ;;  %710 = vperm.xlu0 %2814, %v655_v30   ;;  %v634_v19 = vld [vmem:[%s3622_s12 + $0x10] sm:$0xff]  ;;  %v635_v22 = vld [vmem:[%s3622_s12 + $0x18] sm:$0xff]  ;;  %v633_v23 = vld [vmem:[%s3622_s12 + $0x8] sm:$0xff]  ;;  %s2312_s19 = ssub.s32 (%p4214_p3), 25, %s3637_s23 }
  0xc4   : > { %v736_v25 = vld [vmem:[%s3671_s24] sm:$0xff]  ;;  %v737_v26 = vld [vmem:[%s3671_s24 + $0x8] sm:$0xff]  ;;  %v738_v40 = vld [vmem:[%s3671_s24 + $0x10] sm:$0xff]  ;;  %p2313_p5 = scmp.lt.s32.totalorder (%p4214_p3), %s2312_s19, 13 }
  0xc5   : > { %1184 = vmatpush1.bf16.msra.mxu0 %v2862_v46  ;;  %1285 = vmatpush1.bf16.msra.mxu1 %v2863_v47  ;;  %v749_v32 = vpack.c.bf16 %v737_v26, %v736_v25  ;;  %v637_v37 = vld [vmem:[%s3622_s12 + $0x28] sm:$0xff]  ;;  %v636_v39 = vld [vmem:[%s3622_s12 + $0x20] sm:$0xff]  ;;  %v639_v47 = vld [vmem:[%s3622_s12 + $0x38] sm:$0xff] }
  0xc6   : > { %1185 = vmatprep.subr.bf16.mxu0 %v2864_v48  ;;  %1286 = vmatprep.subr.bf16.mxu1 %v2866_v49  ;;  %v739_v41 = vld [vmem:[%s3671_s24 + $0x18] sm:$0xff] }
  0xc7   : > { %2246 = vperm.xlu1 %2815, %v2683_v35   ;;  %720 = vperm.xlu0 %2814, %v657_v36   ;;  %v2912_v35 = vld [vmem:[#allocation8] ss:$8 sps:$4 sm:$0xff]   ;;  %v750_v44 = vpack.c.bf16 %v739_v41, %v738_v40  ;;  %v2920_v25 = vld [vmem:[#allocation8 + $0x24] ss:$8 sps:$4 sm:$0xff]  }
  0xc8   : > { %v638_v49 = vld [vmem:[%s3622_s12 + $0x30] sm:$0xff] }
  0xc9   : > { %1186 = vmatpush1.bf16.msra.mxu0 %v2868_v50  ;;  %1287 = vmatpush1.bf16.msra.mxu1 %v2869_v51  ;;  %v740_v50 = vld [vmem:[%s3671_s24 + $0x20] sm:$0xff]  ;;  %v741_v51 = vld [vmem:[%s3671_s24 + $0x28] sm:$0xff]  ;;  %v2918_v26 = vld [vmem:[#allocation8 + $0x20] ss:$8 sps:$4 sm:$0xff]  }
  0xca   : > { %1187 = vmatprep.subr.bf16.mxu0 %v2870_v52  ;;  %1288 = vmatprep.subr.bf16.mxu1 %v2872_v53  ;;  %v2936_v40 = vld [vmem:[#allocation9] ss:$8 sps:$4 sm:$0xff]   ;;  %v2938_v41 = vld [vmem:[#allocation9 + $0x4] ss:$8 sps:$4 sm:$0xff]  }
  0xcd   : > { %1188 = vmatpush1.bf16.msra.mxu0 %v2874_v54  ;;  %1289 = vmatpush1.bf16.msra.mxu1 %v2875_v55  ;;  %v751_v54 = vpack.c.bf16 %v741_v51, %v740_v50  ;;  %v2947_v50 = vld [vmem:[#allocation9 + $0x34] ss:$8 sps:$4 sm:$0xff]   ;;  %v2945_v51 = vld [vmem:[#allocation9 + $0x30] ss:$8 sps:$4 sm:$0xff]  }
  0xce   : > { %1189 = vmatprep.subr.bf16.mxu0 %v2876_v56  ;;  %1290 = vmatprep.subr.bf16.mxu1 %v2878_v57  ;;  %v641_v57 = vld [vmem:[%s3622_s12 + $0x48] sm:$0xff] }
  0xd1   : > { %1190 = vmatpush1.bf16.msra.mxu0 %v2880_v58  ;;  %1291 = vmatpush1.bf16.msra.mxu1 %v2881_v59  ;;  %v640_v59 = vld [vmem:[%s3622_s12 + $0x40] sm:$0xff] }
  0xd2   : > { %1191 = vmatprep.subr.bf16.mxu0 %v2882_v60  ;;  %1292 = vmatprep.subr.bf16.mxu1 %v2884_v61  ;;  %v742_v60 = vld [vmem:[%s3671_s24 + $0x30] sm:$0xff]  ;;  %v743_v61 = vld [vmem:[%s3671_s24 + $0x38] sm:$0xff] }
  0xd5   : > { %1192 = vmatpush1.bf16.msra.mxu0 %v2886_v62  ;;  %1293 = vmatpush1.bf16.msra.mxu1 %v2887_v63 }
  0xd6   : > { %1193 = vmatprep.subr.bf16.mxu0 %v2888_v0  ;;  %1294 = vmatprep.subr.bf16.mxu1 %v2890_v2  ;;  %v752_v0 = vpack.c.bf16 %v743_v61, %v742_v60  ;;  %v2953_v60 = vld [vmem:[#allocation9 + $0x54] ss:$8 sps:$4 sm:$0xff]  }
  0xd9   : > { %1194 = vmatpush1.bf16.msra.mxu0 %v2892_v3  ;;  %1295 = vmatpush1.bf16.msra.mxu1 %v2893_v4  ;;  %v643_v4 = vld [vmem:[%s3622_s12 + $0x58] sm:$0xff] }
  0xda   : > { %1195 = vmatprep.subr.bf16.mxu0 %v2894_v5  ;;  %1296 = vmatprep.subr.bf16.mxu1 %v2896_v6  ;;  %v642_v6 = vld [vmem:[%s3622_s12 + $0x50] sm:$0xff] }
  0xdd   : > { %1196 = vmatpush1.bf16.msra.mxu0 %v2898_v7  ;;  %1297 = vmatpush1.bf16.msra.mxu1 %v2899_v8  ;;  %v744_v7 = vld [vmem:[%s3671_s24 + $0x40] sm:$0xff]  ;;  %v745_v8 = vld [vmem:[%s3671_s24 + $0x48] sm:$0xff] }
  0xde   : > { %1197 = vmatprep.subr.bf16.mxu0 %v2900_v9  ;;  %1298 = vmatprep.subr.bf16.mxu1 %v2902_v10 }
  0xe1   : > { %1198 = vmatpush1.bf16.msra.mxu0 %v2904_v11  ;;  %1299 = vmatpush1.bf16.msra.mxu1 %v2905_v12  ;;  %v753_v11 = vpack.c.bf16 %v745_v8, %v744_v7  ;;  %v2956_v7 = vld [vmem:[#allocation9 + $0x64] ss:$8 sps:$4 sm:$0xff]  }
  0xe2   : > { %1199 = vmatprep.subr.bf16.mxu0 %v2906_v13  ;;  %1300 = vmatprep.subr.bf16.mxu1 %v2908_v14  ;;  %v644_v14 = vld [vmem:[%s3622_s12 + $0x60] sm:$0xff]  ;;  %s4000_s12 = scalar_lea.vmem [#allocation11], %s3618_s25 }
  0xe5   : > { %1200 = vmatpush1.bf16.msra.mxu0 %v2910_v15  ;;  %1301 = vmatpush1.bf16.msra.mxu1 %v2911_v16  ;;  %v746_v15 = vld [vmem:[%s3671_s24 + $0x50] sm:$0xff]  ;;  %v747_v16 = vld [vmem:[%s3671_s24 + $0x58] sm:$0xff] }
  0xe6   : > { %1746 = vmatprep.subr.bf16.mxu0 %v2914_v17  ;;  %2091 = vmatprep.subr.bf16.mxu1 %v2938_v41 }
 0x12e   : > { %v671_v18 = vpop.permute.xlu1 %670  ;;  %v661_v20 = vpop.permute.xlu0 %660 }
 0x12f   : > { %v3677_v24 = vmul.f32 %v671_v18, %v634_v19  ;;  %v3681_v29 = vmul.f32 %v661_v20, %v632_v21  ;;  %v754_v18 = vpack.c.bf16 %v747_v16, %v746_v15  ;;  %v748_v20 = vld [vmem:[%s3671_s24 + $0x60] sm:$0xff]  ;;  %s620_s24 = scalar_lea.vmem %s4212_s3, %s2544_s15 }
 0x130   : > { %v755_v21 = vpack.c.bf16 %v748_v20, %v748_v20  ;;  %v2954_v20 = vld [vmem:[#allocation9 + $0x60] ss:$8 sps:$4 sm:$0xff]  }
 0x132   : > { %v676_v27 = vpop.permute.xlu1 %675  ;;  %v666_v28 = vpop.permute.xlu0 %665 }
 0x133   : > { %v3683_v30 = vmul.f32 %v676_v27, %v635_v22  ;;  %v3685_v31 = vmul.f32 %v666_v28, %v633_v23  ;;  %v2917_v22 = vld [vmem:[#allocation8 + $0x14] ss:$8 sps:$4 sm:$0xff]   ;;  %v2915_v23 = vld [vmem:[#allocation8 + $0x10] ss:$8 sps:$4 sm:$0xff]  }
 0x134   : > { %v2923_v27 = vld [vmem:[#allocation8 + $0x34] ss:$8 sps:$4 sm:$0xff]   ;;  %v2921_v28 = vld [vmem:[#allocation8 + $0x30] ss:$8 sps:$4 sm:$0xff]  }
 0x135   : > { %v757_v33 = vpack.c.bf16 %v3683_v30, %v3677_v24  ;;  %v756_v34 = vpack.c.bf16 %v3685_v31, %v3681_v29 }
 0x136   : > { %v686_v36 = vpop.permute.xlu1 %685  ;;  %v681_v38 = vpop.permute.xlu0 %680 }
 0x137   : > { %1201 = vmatprep.mubr.bf16.mxu0 %v756_v34  ;;  %1302 = vmatprep.mubr.bf16.mxu1 %v756_v34  ;;  %v3695_v42 = vmul.f32 %v686_v36, %v637_v37  ;;  %v3697_v43 = vmul.f32 %v681_v38, %v636_v39  ;;  %v2929_v34 = vld [vmem:[#allocation8 + $0x54] ss:$8 sps:$4 sm:$0xff]   ;;  %v2932_v36 = vld [vmem:[#allocation8 + $0x64] ss:$8 sps:$4 sm:$0xff]   ;;  %v2930_v37 = vld [vmem:[#allocation8 + $0x60] ss:$8 sps:$4 sm:$0xff]  }
 0x138   : > { %1202 = vmatmul.mubr.bf16.vlgmr.msra.gmra.mrb[0].mxu0 %v749_v32  ;;  %1303 = vmatmul.mubr.bf16.vlgmr.msra.gmra.mrb[0].mxu1 %v749_v32  ;;  %v2926_v32 = vld [vmem:[#allocation8 + $0x44] ss:$8 sps:$4 sm:$0xff]   ;;  %v2935_v38 = vld [vmem:[#allocation8 + $0x74] ss:$8 sps:$4 sm:$0xff]   ;;  %v2933_v39 = vld [vmem:[#allocation8 + $0x70] ss:$8 sps:$4 sm:$0xff]  }
 0x139   : > { %1211 = vmatprep.mubr.bf16.mxu0 %v757_v33  ;;  %1312 = vmatprep.mubr.bf16.mxu1 %v757_v33  ;;  %v758_v45 = vpack.c.bf16 %v3695_v42, %v3697_v43  ;;  %v2924_v33 = vld [vmem:[#allocation8 + $0x40] ss:$8 sps:$4 sm:$0xff]  }
 0x13a   : > { %1747 = vmatpush1.bf16.msra.mxu0 %v2912_v35  ;;  %v696_v46 = vpop.permute.xlu1 %695  ;;  %v691_v48 = vpop.permute.xlu0 %690  ;;  %v2927_v35 = vld [vmem:[#allocation8 + $0x50] ss:$8 sps:$4 sm:$0xff]   ;;  %2092 = vmatpush1.bf16.msra.mxu1 %v2936_v40 }
 0x13b   : > { %v3705_v52 = vmul.f32 %v696_v46, %v639_v47  ;;  %v3707_v53 = vmul.f32 %v691_v48, %v638_v49  ;;  %1748 = vmatprep.subr.bf16.mxu0 %v2917_v22  ;;  %v829_v46 = vlaneseq  ;;  %v2944_v47 = vld [vmem:[#allocation9 + $0x24] ss:$8 sps:$4 sm:$0xff]   ;;  %v2942_v48 = vld [vmem:[#allocation9 + $0x20] ss:$8 sps:$4 sm:$0xff]   ;;  %v2959_v22 = vld [vmem:[#allocation9 + $0x74] ss:$8 sps:$4 sm:$0xff]  }
 0x13d   : > { %v759_v55 = vpack.c.bf16 %v3705_v52, %v3707_v53  ;;  %v3740_v49 = vshrl.u32 %v829_v46, 7  ;;  %v2960_v46 = vld [vmem:[#allocation9 + $0x80] ss:$8 sps:$4 sm:$0xff]  }
 0x13e   : > { %v706_v56 = vpop.permute.xlu1 %705  ;;  %v701_v58 = vpop.permute.xlu0 %700  ;;  %1749 = vmatpush1.bf16.msra.mxu0 %v2915_v23 }
 0x13f   : > { %v3715_v62 = vmul.f32 %v706_v56, %v641_v57  ;;  %v3717_v63 = vmul.f32 %v701_v58, %v640_v59  ;;  %1750 = vmatprep.subr.bf16.mxu0 %v2920_v25  ;;  %v3748_v56 = vld [vmem:[%s4163_s4] sm:$0xf]  ;;  %v3751_v57 = vsub.s32 1, %v3740_v49  ;;  %v2948_v58 = vld [vmem:[#allocation9 + $0x40] ss:$8 sps:$4 sm:$0xff]  }
 0x140   : > { %1212 = vmatmul.mubr.bf16.gmra.mrb[4].mxu0 %v750_v44  ;;  %1313 = vmatmul.mubr.bf16.gmra.mrb[4].mxu1 %v750_v44  ;;  %v2941_v44 = vld [vmem:[#allocation9 + $0x14] ss:$8 sps:$4 sm:$0xff]  }
 0x141   : > { %1221 = vmatprep.mubr.bf16.mxu0 %v758_v45  ;;  %1322 = vmatprep.mubr.bf16.mxu1 %v758_v45  ;;  %v760_v2 = vpack.c.bf16 %v3715_v62, %v3717_v63  ;;  %v2939_v45 = vld [vmem:[#allocation9 + $0x10] ss:$8 sps:$4 sm:$0xff]   ;;  %v3759_v61 = vrot.slane %v3748_v56, %v3751_v57 }
 0x142   : > { %v716_v3 = vpop.permute.xlu1 %715  ;;  %v711_v5 = vpop.permute.xlu0 %710  ;;  %1751 = vmatpush1.bf16.msra.mxu0 %v2918_v26  ;;  %2093 = vmatprep.subr.bf16.mxu1 %v2941_v44 }
 0x143   : > { %v3725_v9 = vmul.f32 %v716_v3, %v643_v4  ;;  %v3727_v10 = vmul.f32 %v711_v5, %v642_v6  ;;  %1752 = vmatprep.subr.bf16.mxu0 %v2923_v27  ;;  %2094 = vmatpush1.bf16.msra.mxu1 %v2939_v45  ;;  %v2951_v3 = vld [vmem:[#allocation9 + $0x50] ss:$8 sps:$4 sm:$0xff]  }
 0x144   : > { %2095 = vmatprep.subr.bf16.mxu1 %v2944_v47  ;;  %v2957_v27 = vld [vmem:[#allocation9 + $0x70] ss:$8 sps:$4 sm:$0xff]  }
 0x145   : > { %v761_v12 = vpack.c.bf16 %v3725_v9, %v3727_v10 }
 0x146   : > { %v721_v13 = vpop.permute.xlu0 %720  ;;  %1753 = vmatpush1.bf16.msra.mxu0 %v2921_v28 }
 0x147   : > { %v3734_v17 = vmul.f32 %v721_v13, %v644_v14  ;;  %1754 = vmatprep.subr.bf16.mxu0 %v2926_v32  ;;  %2096 = vmatpush1.bf16.msra.mxu1 %v2942_v48  ;;  %v2965_v48 = vld [vmem:[#allocation9 + $0x94] ss:$8 sps:$4 sm:$0xff]  }
 0x148   : > { %1222 = vmatmul.mubr.bf16.gmra.mrb[8].mxu0 %v751_v54  ;;  %1323 = vmatmul.mubr.bf16.gmra.mrb[8].mxu1 %v751_v54  ;;  %v3743_v54 = vsub.s32 0, %v3740_v49 }
 0x149   : > { %1231 = vmatprep.mubr.bf16.mxu0 %v759_v55  ;;  %1332 = vmatprep.mubr.bf16.mxu1 %v759_v55  ;;  %v762_v19 = vpack.c.bf16 %v3734_v17, %v3734_v17  ;;  %v2950_v55 = vld [vmem:[#allocation9 + $0x44] ss:$8 sps:$4 sm:$0xff]  }
 0x14a   : > { %1755 = vmatpush1.bf16.msra.mxu0 %v2924_v33  ;;  %2097 = vmatprep.subr.bf16.mxu1 %v2947_v50  ;;  %v3755_v59 = vrot.slane %v3748_v56, %v3743_v54 }
 0x14b   : > { %1756 = vmatprep.subr.bf16.mxu0 %v2929_v34  ;;  %2098 = vmatpush1.bf16.msra.mxu1 %v2945_v51  ;;  %v2962_v34 = vld [vmem:[#allocation9 + $0x84] ss:$8 sps:$4 sm:$0xff]  }
 0x14c   : > { %2099 = vmatprep.subr.bf16.mxu1 %v2950_v55 }
 0x14e   : > { %1757 = vmatpush1.bf16.msra.mxu0 %v2927_v35 }
 0x14f   : > { %1758 = vmatprep.subr.bf16.mxu0 %v2932_v36  ;;  %2100 = vmatpush1.bf16.msra.mxu1 %v2948_v58 }
 0x150   : > { %1232 = vmatmul.mubr.bf16.gmra.mrb[12].mxu0 %v752_v0  ;;  %1333 = vmatmul.mubr.bf16.gmra.mrb[12].mxu1 %v752_v0 }
 0x151   : > { %1241 = vmatprep.mubr.bf16.mxu0 %v760_v2  ;;  %1342 = vmatprep.mubr.bf16.mxu1 %v760_v2 }
 0x152   : > { %1759 = vmatpush1.bf16.msra.mxu0 %v2930_v37  ;;  %2101 = vmatprep.subr.bf16.mxu1 %v2953_v60 }
 0x153   : > { %1760 = vmatprep.subr.bf16.mxu0 %v2935_v38  ;;  %2102 = vmatpush1.bf16.msra.mxu1 %v2951_v3  ;;  %v2963_v3 = vld [vmem:[#allocation9 + $0x90] ss:$8 sps:$4 sm:$0xff]  }
 0x154   : > { %2103 = vmatprep.subr.bf16.mxu1 %v2956_v7 }
 0x156   : > { %1761 = vmatpush1.bf16.msra.mxu0 %v2933_v39 }
 0x157   : > { %2104 = vmatpush1.bf16.msra.mxu1 %v2954_v20 }
 0x158   : > { %1242 = vmatmul.mubr.bf16.gmra.mrb[16].mxu0 %v753_v11  ;;  %1343 = vmatmul.mubr.bf16.gmra.mrb[16].mxu1 %v753_v11 }
 0x159   : > { %1251 = vmatprep.mubr.bf16.mxu0 %v761_v12  ;;  %1352 = vmatprep.mubr.bf16.mxu1 %v761_v12 }
 0x15a   : > { %2105 = vmatprep.subr.bf16.mxu1 %v2959_v22 }
 0x15b   : > { %2106 = vmatpush1.bf16.msra.mxu1 %v2957_v27 }
 0x15c   : > { %2107 = vmatprep.subr.bf16.mxu1 %v2962_v34 }
 0x15f   : > { %2108 = vmatpush1.bf16.msra.mxu1 %v2960_v46 }
 0x160   : > { %1252 = vmatmul.mubr.bf16.gmra.mrb[20].mxu0 %v754_v18  ;;  %1353 = vmatmul.mubr.bf16.gmra.mrb[20].mxu1 %v754_v18 }
 0x161   : > { %1261 = vmatprep.mubr.bf16.mxu0 %v762_v19  ;;  %1362 = vmatprep.mubr.bf16.mxu1 %v762_v19 }
 0x162   : > { %2109 = vmatprep.subr.bf16.mxu1 %v2965_v48  ;;  %v2969_v48 = vld [vmem:[#allocation9 + $0xb0] ss:$8 sps:$4 sm:$0xff]  }
 0x163   : > { %2110 = vmatpush1.bf16.msra.mxu1 %v2963_v3 }
 0x168   : > { %1262 = vmatmul.mubr.bf16.gmra.mrb[24].mxu0 %v755_v21  ;;  %1363 = vmatmul.mubr.bf16.gmra.mrb[24].mxu1 %v755_v21 }
 0x169   : > { %1778 = vmatprep.mubr.bf16.mxu0 %v4183_v1 }
 0x20b   : > { %v1203_v0 = vpop.f32.mrb[0].mxu0  ;;  %v3761_v2 = vpop.f32.mrb[0].mxu1 }
 0x20c   : > { %v1204_v4 = vadd.f32 %v1203_v0, %v3755_v59  ;;  %v1205_v5 = vpop.f32.mrb[1].mxu0  ;;  %v3764_v6 = vpop.f32.mrb[1].mxu1 }
 0x20d   : > { %v1206_v8 = vadd.f32 %v1205_v5, %v3759_v61  ;;  %v1207_v11 = vpop.f32.mrb[2].mxu0  ;;  %v3767_v12 = vpop.f32.mrb[2].mxu1 }
 0x20e   : > { %v2609_v13 = vmul.f32 -1.442695, %v1204_v4  ;;  %v1208_v14 = vadd.f32 %v1207_v11, %v3755_v59  ;;  %v1209_v15 = vpop.f32.mrb[3].mxu0  ;;  %v3770_v16 = vpop.f32.mrb[3].mxu1 }
 0x20f   : > { %v2622_v18 = vmul.f32 -1.442695, %v1206_v8  ;;  %v1210_v19 = vadd.f32 %v1209_v15, %v3759_v61  ;;  %v843_v8 = vsub.s32 3, %v3740_v49 }
 0x210   : > { %2984 = vpow2.f32 %v2609_v13  ;;  %v2610_v21 = vmul.f32 -1.442695, %v1208_v14  ;;  %v2968_v13 = vld [vmem:[#allocation9 + $0xa4] ss:$8 sps:$4 sm:$0xff]  }
 0x211   : > { %2986 = vpow2.f32 %v2622_v18  ;;  %v2623_v23 = vmul.f32 -1.442695, %v1210_v19  ;;  %2111 = vmatprep.subr.bf16.mxu1 %v2968_v13 }
 0x212   : > { %2988 = vpow2.f32 %v2610_v21 }
 0x213   : > { %2990 = vpow2.f32 %v2623_v23  ;;  %v1213_v25 = vpop.f32.mrb[4].mxu0  ;;  %v3773_v26 = vpop.f32.mrb[4].mxu1 }
 0x214   : > { %v1214_v28 = vadd.f32 %v1213_v25, %v3755_v59  ;;  %v1215_v32 = vpop.f32.mrb[5].mxu0  ;;  %v3776_v33 = vpop.f32.mrb[5].mxu1 }
 0x215   : > { %v1216_v35 = vadd.f32 %v1215_v32, %v3759_v61  ;;  %v1217_v36 = vpop.f32.mrb[6].mxu0  ;;  %v3779_v37 = vpop.f32.mrb[6].mxu1  ;;  %v2966_v32 = vld [vmem:[#allocation9 + $0xa0] ss:$8 sps:$4 sm:$0xff]  }
 0x216   : > { %v2611_v38 = vmul.f32 -1.442695, %v1214_v28  ;;  %v1218_v39 = vadd.f32 %v1217_v36, %v3755_v59  ;;  %v1219_v40 = vpop.f32.mrb[7].mxu0  ;;  %v3782_v41 = vpop.f32.mrb[7].mxu1  ;;  %v839_v28 = vsub.s32 2, %v3740_v49  ;;  %2112 = vmatpush1.bf16.msra.mxu1 %v2966_v32 }
 0x217   : > { %v2624_v44 = vmul.f32 -1.442695, %v1216_v35  ;;  %v1220_v45 = vadd.f32 %v1219_v40, %v3759_v61 }
 0x218   : > { %2992 = vpow2.f32 %v2611_v38  ;;  %v2612_v47 = vmul.f32 -1.442695, %v1218_v39  ;;  %v3800_v38 = vrot.slane %v3748_v56, %v843_v8  ;;  %v2971_v39 = vld [vmem:[#allocation9 + $0xb4] ss:$8 sps:$4 sm:$0xff]   ;;  %v3803_v46 = vrot.slane %v3748_v56, %v839_v28 }
 0x219   : > { %v2625_v50 = vmul.f32 -1.442695, %v1220_v45  ;;  %2113 = vmatprep.subr.bf16.mxu1 %v2971_v39 }
 0x21a   : > { %v2985_v51 = vpop.eup %2984  ;;  %2994 = vpow2.f32 %v2612_v47  ;;  %2114 = vmatpush1.bf16.msra.mxu1 %v2969_v48  ;;  %v1311_v32 = vadd.f32 %v3770_v16, %v3800_v38  ;;  %v1317_v16 = vadd.f32 %v3776_v33, %v3800_v38 }
 0x21b   : > { %v2987_v55 = vpop.eup %2986  ;;  %v1410_v58 = vadd.f32 1.0, %v2985_v51  ;;  %2996 = vpow2.f32 %v2624_v44  ;;  %v1223_v60 = vpop.f32.mrb[8].mxu0 }
 0x21c   : > { %v3785_v0 = vpop.f32.mrb[8].mxu1  ;;  %v2989_v4 = vpop.eup %2988  ;;  %2998 = vpow2.f32 %v2625_v50  ;;  %v1224_v5 = vadd.f32 %v1223_v60, %v3755_v59  ;;  %v1488_v20 = vadd.f32 1.0, %v2987_v55  ;;  %v1307_v55 = vadd.f32 %v3764_v6, %v3800_v38 }
 0x21d   : > { %v1225_v7 = vpop.f32.mrb[9].mxu0  ;;  %v3789_v11 = vpop.f32.mrb[9].mxu1  ;;  %3000 = vrcp.f32 %v1410_v58  ;;  %v1411_v15 = vadd.f32 1.0, %v2989_v4  ;;  %v2974_v4 = vld [vmem:[#allocation9 + $0xc4] ss:$8 sps:$4 sm:$0xff]  }
 0x21e   : > { %v2991_v14 = vpop.eup %2990  ;;  %v1227_v18 = vpop.f32.mrb[10].mxu0  ;;  %v2613_v21 = vmul.f32 -1.442695, %v1224_v5  ;;  %v1226_v22 = vadd.f32 %v1225_v7, %v3759_v61  ;;  %2115 = vmatprep.subr.bf16.mxu1 %v2974_v4 }
 0x21f   : > { %v3791_v19 = vpop.f32.mrb[10].mxu1  ;;  %v1228_v23 = vadd.f32 %v1227_v18, %v3755_v59  ;;  %v1229_v25 = vpop.f32.mrb[11].mxu0  ;;  %3002 = vrcp.f32 %v1411_v15  ;;  %v1489_v34 = vadd.f32 1.0, %v2991_v14 }
 0x220   : > { %v3795_v27 = vpop.f32.mrb[11].mxu1  ;;  %v1230_v36 = vadd.f32 %v1229_v25, %v3759_v61  ;;  %3004 = vpow2.f32 %v2613_v21  ;;  %v2626_v44 = vmul.f32 -1.442695, %v1226_v22  ;;  %v1305_v22 = vadd.f32 %v3761_v2, %v3803_v46  ;;  %v2972_v25 = vld [vmem:[#allocation9 + $0xc0] ss:$8 sps:$4 sm:$0xff]  }
 0x221   : > { %v2614_v35 = vmul.f32 -1.442695, %v1228_v23  ;;  %3006 = vrcp.f32 %v1488_v20  ;;  %v1309_v2 = vadd.f32 %v3767_v12, %v3803_v46  ;;  %2116 = vmatpush1.bf16.msra.mxu1 %v2972_v25 }
 0x222   : > { %v2993_v40 = vpop.eup %2992  ;;  %v2627_v51 = vmul.f32 -1.442695, %v1230_v36 }
 0x223   : > { %v1412_v45 = vadd.f32 1.0, %v2993_v40  ;;  %3008 = vpow2.f32 %v2614_v35  ;;  %v1233_v49 = vpop.f32.mrb[12].mxu0  ;;  %v3805_v47 = vpop.f32.mrb[12].mxu1  ;;  %v2977_v35 = vld [vmem:[#allocation9 + $0xd4] ss:$8 sps:$4 sm:$0xff]  }
 0x224   : > { %v2995_v50 = vpop.eup %2994  ;;  %3010 = vrcp.f32 %v1489_v34  ;;  %v1234_v58 = vadd.f32 %v1233_v49, %v3755_v59  ;;  %v1235_v60 = vpop.f32.mrb[13].mxu0  ;;  %2117 = vmatprep.subr.bf16.mxu1 %v2977_v35  ;;  %v1321_v35 = vadd.f32 %v3782_v41, %v3800_v38 }
 0x225   : > { %v3810_v3 = vpop.f32.mrb[13].mxu1  ;;  %v2997_v56 = vpop.eup %2996  ;;  %3012 = vrcp.f32 %v1412_v45  ;;  %v1413_v5 = vadd.f32 1.0, %v2995_v50  ;;  %v1236_v7 = vadd.f32 %v1235_v60, %v3759_v61 }
 0x226   : > { %v1237_v8 = vpop.f32.mrb[14].mxu0  ;;  %v3813_v13 = vpop.f32.mrb[14].mxu1  ;;  %3014 = vpow2.f32 %v2626_v44  ;;  %v2615_v15 = vmul.f32 -1.442695, %v1234_v58  ;;  %v1490_v39 = vadd.f32 1.0, %v2997_v56 }
 0x227   : > { %v2999_v14 = vpop.eup %2998  ;;  %v1238_v6 = vadd.f32 %v1237_v8, %v3755_v59  ;;  %v1239_v18 = vpop.f32.mrb[15].mxu0  ;;  %3016 = vrcp.f32 %v1413_v5  ;;  %v2628_v23 = vmul.f32 -1.442695, %v1236_v7 }
 0x228   : > { %v3816_v20 = vpop.f32.mrb[15].mxu1  ;;  %v3001_v21 = vpop.eup %3000  ;;  %3018 = vpow2.f32 %v2627_v51  ;;  %v1240_v40 = vadd.f32 %v1239_v18, %v3759_v61  ;;  %v1491_v48 = vadd.f32 1.0, %v2999_v14 }
 0x229   : > { %v1527_v28 = vmul.f32 %v3001_v21, %v1307_v55  ;;  %v2616_v34 = vmul.f32 -1.442695, %v1238_v6  ;;  %v3003_v36 = vpop.eup %3002  ;;  %3020 = vpow2.f32 %v2615_v15  ;;  %v2975_v55 = vld [vmem:[#allocation9 + $0xd0] ss:$8 sps:$4 sm:$0xff]  }
 0x22a   : > { %3022 = vpow2.f32 %v2628_v23  ;;  %v1528_v45 = vmul.f32 %v3003_v36, %v1311_v32  ;;  %v3005_v49 = vpop.eup %3004  ;;  %v2629_v8 = vmul.f32 -1.442695, %v1240_v40  ;;  %2118 = vmatpush1.bf16.msra.mxu1 %v2975_v55  ;;  %v1315_v32 = vadd.f32 %v3773_v26, %v3803_v46 }
 0x22b   : > { %v1540_v44 = vadd.f32 %v1527_v28, %v1305_v22  ;;  %3024 = vpow2.f32 %v2616_v34  ;;  %v1243_v50 = vpop.f32.mrb[16].mxu0  ;;  %v3827_v51 = vpop.f32.mrb[16].mxu1  ;;  %v1414_v60 = vadd.f32 1.0, %v3005_v49  ;;  %v1325_v26 = vadd.f32 %v3785_v0, %v3803_v46 }
 0x22c   : > { %v3829_v58 = vpop.eup %3006  ;;  %v1541_v4 = vadd.f32 %v1528_v45, %v1309_v2  ;;  %v1244_v12 = vadd.f32 %v1243_v50, %v3755_v59  ;;  %v1245_v56 = vpop.f32.mrb[17].mxu0  ;;  %v1319_v2 = vadd.f32 %v3779_v37, %v3803_v46  ;;  %v1329_v0 = vadd.f32 %v3791_v19, %v3803_v46 }
 0x22d   : > { %3026 = vtanh.f32 %v1540_v44  ;;  %v3832_v5 = vpop.f32.mrb[17].mxu1  ;;  %v3009_v7 = vpop.eup %3008  ;;  %v1246_v33 = vadd.f32 %v1245_v56, %v3759_v61 }
 0x22e   : > { %3028 = vrcp.f32 %v1490_v39  ;;  %v1247_v14 = vpop.f32.mrb[18].mxu0  ;;  %v3835_v15 = vpop.f32.mrb[18].mxu1  ;;  %v1415_v18 = vadd.f32 1.0, %v3009_v7  ;;  %v2617_v25 = vmul.f32 -1.442695, %v1244_v12  ;;  %v1327_v12 = vadd.f32 %v3789_v11, %v3800_v38 }
 0x22f   : > { %v3837_v6 = vpop.eup %3010  ;;  %3030 = vrcp.f32 %v1414_v60  ;;  %v1249_v21 = vpop.f32.mrb[19].mxu0  ;;  %v2630_v39 = vmul.f32 -1.442695, %v1246_v33  ;;  %v1248_v50 = vadd.f32 %v1247_v14, %v3755_v59 }
 0x230   : > { %v3839_v22 = vpop.f32.mrb[19].mxu1  ;;  %v3013_v23 = vpop.eup %3012  ;;  %3032 = vrcp.f32 %v1491_v48 }
 0x231   : > { %v3015_v28 = vpop.eup %3014  ;;  %3034 = vrcp.f32 %v1415_v18  ;;  %v1529_v34 = vmul.f32 %v3013_v23, %v1317_v16 }
 0x232   : > { %v3017_v36 = vpop.eup %3016  ;;  %3036 = vpow2.f32 %v2629_v8  ;;  %v1492_v48 = vadd.f32 1.0, %v3015_v28  ;;  %v1566_v8 = vsub.f32 1.0, %v3829_v58  ;;  %v1250_v28 = vadd.f32 %v1249_v21, %v3759_v61 }
 0x233   : > { %v3019_v40 = vpop.eup %3018  ;;  %3038 = vtanh.f32 %v1541_v4  ;;  %v1542_v44 = vadd.f32 %v1529_v34, %v1315_v32  ;;  %v1530_v45 = vmul.f32 %v3017_v36, %v1321_v35  ;;  %v1253_v16 = vpop.f32.mrb[20].mxu0  ;;  %v1592_v36 = vmul.f32 %v3829_v58, %v3681_v29 }
 0x234   : > { %v3021_v49 = vpop.eup %3020  ;;  %3040 = vpow2.f32 %v2617_v25  ;;  %v3850_v41 = vpop.f32.mrb[20].mxu1  ;;  %v1493_v33 = vadd.f32 1.0, %v3019_v40  ;;  %v1254_v11 = vadd.f32 %v1253_v16, %v3755_v59  ;;  %v3871_v21 = vadd.f32 %v3805_v47, %v3803_v46 }
 0x235   : > { %v3023_v55 = vpop.eup %3022  ;;  %v1416_v60 = vadd.f32 1.0, %v3021_v49  ;;  %3042 = vtanh.f32 %v1542_v44  ;;  %v1543_v4 = vadd.f32 %v1530_v45, %v1319_v2  ;;  %v1255_v37 = vpop.f32.mrb[21].mxu0  ;;  %v1331_v2 = vadd.f32 %v3795_v27, %v3800_v38 }
 0x236   : > { %v3854_v56 = vpop.f32.mrb[21].mxu1  ;;  %v3025_v7 = vpop.eup %3024  ;;  %3044 = vpow2.f32 %v2630_v39  ;;  %v2618_v39 = vmul.f32 -1.442695, %v1248_v50  ;;  %v1494_v44 = vadd.f32 1.0, %v3023_v55  ;;  %v1337_v29 = vadd.f32 %v3810_v3, %v3800_v38 }
 0x237   : > { %v1257_v14 = vpop.f32.mrb[22].mxu0  ;;  %v3859_v18 = vpop.f32.mrb[22].mxu1  ;;  %3046 = vrcp.f32 %v1416_v60  ;;  %v1417_v25 = vadd.f32 1.0, %v3025_v7  ;;  %v1567_v50 = vsub.f32 1.0, %v3837_v6  ;;  %v2631_v16 = vmul.f32 -1.442695, %v1250_v28 }
 0x238   : > { %v3027_v23 = vpop.eup %3026  ;;  %v1259_v32 = vpop.f32.mrb[23].mxu0  ;;  %3048 = vrcp.f32 %v1492_v48  ;;  %v2619_v55 = vmul.f32 -1.442695, %v1254_v11  ;;  %v1258_v7 = vadd.f32 %v1257_v14, %v3755_v59 }
 0x239   : > { %v3863_v34 = vpop.f32.mrb[23].mxu1  ;;  %v3029_v35 = vpop.eup %3028  ;;  %v1579_v19 = vmul.f32 %v3027_v23, %v1566_v8  ;;  %3050 = vrcp.f32 %v1417_v25 }
 0x23a   : > { %v3031_v40 = vpop.eup %3030  ;;  %3052 = vtanh.f32 %v1543_v4  ;;  %v1568_v25 = vsub.f32 1.0, %v3029_v35 }
 0x23b   : > { %v3873_v45 = vpop.eup %3032  ;;  %v1531_v49 = vmul.f32 %v3031_v40, %v1327_v12  ;;  %v1605_v58 = vadd.f32 %v1592_v36, %v1579_v19  ;;  %3054 = vrcp.f32 %v1493_v33  ;;  %v1263_v8 = vpop.f32.mrb[24].mxu0  ;;  %v1593_v12 = vmul.f32 %v3837_v6, %v3685_v31 }
 0x23c   : > { %v3035_v48 = vpop.eup %3034  ;;  %3056 = vpow2.f32 %v2618_v39  ;;  %v3883_v4 = vpop.f32.mrb[24].mxu1  ;;  %v1256_v33 = vadd.f32 %v1255_v37, %v3759_v61  ;;  %v1594_v39 = vmul.f32 %v3029_v35, %v3677_v24  ;;  %v1264_v31 = vadd.f32 %v1263_v8, %v3755_v59 }
 0x23d   : > { %v3037_v27 = vpop.eup %3036  ;;  %v1544_v60 = vadd.f32 %v1531_v49, %v1325_v26  ;;  %v1532_v47 = vmul.f32 %v3035_v48, %v1331_v2  ;;  %1618 = vst [vmem:[%s3880_s11] sm:$0xff] %v1605_v58  ;;  %3058 = vrcp.f32 %v1494_v44  ;;  %v1265_v23 = vpop.f32.mrb[25].mxu0  ;;  %v2620_v48 = vmul.f32 -1.442695, %v1258_v7 }
 0x23e   : > { %v3039_v3 = vpop.eup %3038  ;;  %v3888_v26 = vpop.f32.mrb[25].mxu1  ;;  %v1495_v2 = vadd.f32 1.0, %v3037_v27  ;;  %v1260_v24 = vadd.f32 %v1259_v32, %v3759_v61  ;;  %v1341_v35 = vadd.f32 %v3816_v20, %v3800_v38  ;;  %v1339_v7 = vadd.f32 %v3813_v13, %v3803_v46 }
 0x23f   : > { %v3041_v28 = vpop.eup %3040  ;;  %3060 = vtanh.f32 %v1544_v60  ;;  %v1545_v14 = vadd.f32 %v1532_v47, %v1329_v0  ;;  %v1580_v11 = vmul.f32 %v3039_v3, %v1567_v50  ;;  %v1267_v36 = vpop.f32.mrb[26].mxu0  ;;  %v2632_v50 = vmul.f32 -1.442695, %v1256_v33 }
 0x240   : > { %v1368_v19 = vpop.f32.mrb[26].mxu1  ;;  %v3043_v40 = vpop.eup %3042  ;;  %v1418_v49 = vadd.f32 1.0, %v3041_v28  ;;  %3062 = vpow2.f32 %v2619_v55  ;;  %v1569_v3 = vsub.f32 1.0, %v3873_v45  ;;  %v2633_v28 = vmul.f32 -1.442695, %v1260_v24 }
 0x241   : > { %v1268_v6 = vpop.f32.mrb[27].mxu0  ;;  %v1369_v37 = vpop.f32.mrb[27].mxu1  ;;  %3064 = vpow2.f32 %v2631_v16  ;;  %v1606_v1 = vadd.f32 %v1593_v12, %v1580_v11  ;;  %v1581_v60 = vmul.f32 %v3043_v40, %v1568_v25  ;;  %v2621_v16 = vmul.f32 -1.442695, %v1264_v31 }
 0x242   : > { %v3045_v44 = vpop.eup %3044  ;;  %3066 = vrcp.f32 %v1418_v49  ;;  %v1595_v25 = vmul.f32 %v3873_v45, %v3683_v30 }
 0x243   : > { %v3047_v0 = vpop.eup %3046  ;;  %3068 = vtanh.f32 %v1545_v14  ;;  %1619 = vst [vmem:[%s3880_s11 + $0x8] sm:$0xff] %v1606_v1  ;;  %v1631_v55 = vpack.c.bf16 %v1606_v1, %v1605_v58  ;;  %v1607_v47 = vadd.f32 %v1594_v39, %v1581_v60  ;;  %v1496_v32 = vadd.f32 1.0, %v3045_v44 }
 0x244   : > { %v3049_v27 = vpop.eup %3048  ;;  %v1533_v59 = vmul.f32 %v3047_v0, %v1337_v29  ;;  %3070 = vrcp.f32 %v1495_v2  ;;  %v4210_v1 = vmov 0   ;;  %v1347_v2 = vadd.f32 %v3832_v5, %v3800_v38 }
 0x245   : > { %v3051_v8 = vpop.eup %3050  ;;  %3072 = vpow2.f32 %v2620_v48  ;;  %1779 = vmatmul.mubr.bf16.vlgmr.msra.gmra.mrb[28].mxu0 %v1631_v55  ;;  %1620 = vst [vmem:[%s3880_s11 + $0x10] sm:$0xff] %v1607_v47  ;;  %v1570_v11 = vsub.f32 1.0, %v3049_v27  ;;  %v1596_v31 = vmul.f32 %v3049_v27, %v3697_v43  ;;  %v1345_v5 = vadd.f32 %v3827_v51, %v3803_v46 }
 0x246   : > { %v3053_v12 = vpop.eup %3052  ;;  %v1546_v20 = vadd.f32 %v1533_v59, %v3871_v21  ;;  %v1534_v33 = vmul.f32 %v3051_v8, %v1341_v35  ;;  %3074 = vpow2.f32 %v2632_v50  ;;  %1788 = vmatprep.mubr.bf16.mxu0 %v4210_v1  ;;  %v1266_v21 = vadd.f32 %v1265_v23, %v3759_v61 }
 0x247   : > { %v3055_v29 = vpop.eup %3054  ;;  %v1582_v58 = vmul.f32 %v3053_v12, %v1569_v3 }
 0x248   : > { %v3057_v13 = vpop.eup %3056  ;;  %3076 = vtanh.f32 %v1546_v20  ;;  %v1547_v14 = vadd.f32 %v1534_v33, %v1339_v7  ;;  %v2634_v48 = vmul.f32 -1.442695, %v1266_v21  ;;  %v1571_v61 = vsub.f32 1.0, %v3055_v29 }
 0x249   : > { %v3059_v36 = vpop.eup %3058  ;;  %v1419_v39 = vadd.f32 1.0, %v3057_v13  ;;  %3078 = vpow2.f32 %v2621_v16  ;;  %v1608_v19 = vadd.f32 %v1595_v25, %v1582_v58  ;;  %v1597_v24 = vmul.f32 %v3055_v29, %v3695_v42 }
 0x24a   : > { %v3061_v40 = vpop.eup %3060  ;;  %3080 = vrcp.f32 %v1496_v32  ;;  %v1572_v59 = vsub.f32 1.0, %v3059_v36  ;;  %v1598_v32 = vmul.f32 %v3059_v36, %v3707_v53  ;;  %v1351_v33 = vadd.f32 %v3839_v22, %v3800_v38 }
 0x24b   : > { %v3063_v49 = vpop.eup %3062  ;;  %3082 = vrcp.f32 %v1419_v39  ;;  %1621 = vst [vmem:[%s3880_s11 + $0x18] sm:$0xff] %v1608_v19  ;;  %v1632_v30 = vpack.c.bf16 %v1608_v19, %v1607_v47  ;;  %v1583_v45 = vmul.f32 %v3061_v40, %v1570_v11  ;;  %v1357_v25 = vadd.f32 %v3854_v56, %v3800_v38 }
 0x24c   : > { %v3065_v6 = vpop.eup %3064  ;;  %v1420_v37 = vadd.f32 1.0, %v3063_v49  ;;  %3084 = vpow2.f32 %v2633_v28  ;;  %v1355_v56 = vadd.f32 %v3850_v41, %v3803_v46 }
 0x24d   : > { %v3067_v44 = vpop.eup %3066  ;;  %3086 = vtanh.f32 %v1547_v14  ;;  %v1609_v23 = vadd.f32 %v1596_v31, %v1583_v45  ;;  %1789 = vmatmul.mubr.bf16.gmra.mrb[32].mxu0 %v1632_v30  ;;  %v1497_v47 = vadd.f32 1.0, %v3065_v6  ;;  %v1349_v14 = vadd.f32 %v3835_v15, %v3803_v46 }
 0x24e   : > { %v3069_v60 = vpop.eup %3068  ;;  %3088 = vrcp.f32 %v1420_v37  ;;  %v1535_v0 = vmul.f32 %v3067_v44, %v1347_v2  ;;  %1798 = vmatprep.mubr.bf16.mxu0 %v4210_v1  ;;  %v1361_v6 = vadd.f32 %v3863_v34, %v3800_v38  ;;  %v1365_v34 = vadd.f32 %v3883_v4, %v3803_v46 }
 0x24f   : > { %v3071_v50 = vpop.eup %3070  ;;  %v1584_v43 = vmul.f32 %v3069_v60, %v1571_v61  ;;  %1622 = vst [vmem:[%s3880_s11 + $0x20] sm:$0xff] %v1609_v23  ;;  %3090 = vpow2.f32 %v2634_v48  ;;  %v1359_v61 = vadd.f32 %v3859_v18, %v3803_v46 }
 0x250   : > { %v3073_v35 = vpop.eup %3072  ;;  %v1548_v27 = vadd.f32 %v1535_v0, %v1345_v5  ;;  %v1573_v53 = vsub.f32 1.0, %v3071_v50  ;;  %v1599_v19 = vmul.f32 %v3071_v50, %v3705_v52  ;;  %v1367_v52 = vadd.f32 %v3888_v26, %v3800_v38 }
 0x251   : > { %v3075_v55 = vpop.eup %3074  ;;  %v1421_v8 = vadd.f32 1.0, %v3073_v35  ;;  %v1610_v16 = vadd.f32 %v1597_v24, %v1584_v43 }
 0x252   : > { %v3077_v7 = vpop.eup %3076  ;;  %3092 = vtanh.f32 %v1548_v27  ;;  %v1498_v58 = vadd.f32 1.0, %v3075_v55 }
 0x253   : > { %v3079_v51 = vpop.eup %3078  ;;  %3094 = vrcp.f32 %v1421_v8  ;;  %1623 = vst [vmem:[%s3880_s11 + $0x28] sm:$0xff] %v1610_v16  ;;  %v1633_v3 = vpack.c.bf16 %v1610_v16, %v1609_v23  ;;  %v1585_v12 = vmul.f32 %v3077_v7, %v1572_v59 }
 0x254   : > { %v3081_v20 = vpop.eup %3080  ;;  %v1422_v42 = vadd.f32 1.0, %v3079_v51  ;;  %3096 = vrcp.f32 %v1497_v47 }
 0x255   : > { %v3083_v29 = vpop.eup %3082  ;;  %v1611_v13 = vadd.f32 %v1598_v32, %v1585_v12  ;;  %1799 = vmatmul.mubr.bf16.gmra.mrb[36].mxu0 %v1633_v3  ;;  %v1574_v45 = vsub.f32 1.0, %v3081_v20  ;;  %v1600_v48 = vmul.f32 %v3081_v20, %v3717_v63 }
 0x256   : > { %v3085_v28 = vpop.eup %3084  ;;  %3098 = vrcp.f32 %v1422_v42  ;;  %v1536_v11 = vmul.f32 %v3083_v29, %v1351_v33  ;;  %1808 = vmatprep.mubr.bf16.mxu0 %v4210_v1 }
 0x257   : > { %v3087_v36 = vpop.eup %3086  ;;  %1624 = vst [vmem:[%s3880_s11 + $0x30] sm:$0xff] %v1611_v13  ;;  %3100 = vrcp.f32 %v1498_v58  ;;  %v1499_v2 = vadd.f32 1.0, %v3085_v28  ;;  %v2980_v28 = vld [vmem:[#allocation9 + $0xe4] ss:$8 sps:$4 sm:$0xff]  }
 0x258   : > { %v3089_v22 = vpop.eup %3088  ;;  %v1549_v39 = vadd.f32 %v1536_v11, %v1349_v14  ;;  %v1586_v21 = vmul.f32 %v3087_v36, %v1573_v53  ;;  %v2978_v14 = vld [vmem:[#allocation9 + $0xe0] ss:$8 sps:$4 sm:$0xff]   ;;  %2119 = vmatprep.subr.bf16.mxu1 %v2980_v28  ;;  %v2983_v11 = vld [vmem:[#allocation9 + $0xf4] ss:$8 sps:$4 sm:$0xff]  }
 0x259   : > { %v1537_v40 = vmul.f32 %v3089_v22, %v1357_v25  ;;  %v3091_v49 = vpop.eup %3090  ;;  %2120 = vmatpush1.bf16.msra.mxu1 %v2978_v14 }
 0x25a   : > { %3102 = vtanh.f32 %v1549_v39  ;;  %v1612_v15 = vadd.f32 %v1599_v19, %v1586_v21  ;;  %v1500_v5 = vadd.f32 1.0, %v3091_v49  ;;  %2121 = vmatprep.subr.bf16.mxu1 %v2983_v11 }
 0x25b   : > { %v1550_v30 = vadd.f32 %v1537_v40, %v1355_v56 }
 0x25c   : > { %v3093_v31 = vpop.eup %3092  ;;  %1625 = vst [vmem:[%s3880_s11 + $0x38] sm:$0xff] %v1612_v15  ;;  %v1634_v37 = vpack.c.bf16 %v1612_v15, %v1611_v13 }
 0x25d   : > { %v3095_v44 = vpop.eup %3094  ;;  %3104 = vtanh.f32 %v1550_v30  ;;  %v1587_v41 = vmul.f32 %v3093_v31, %v1574_v45 }
 0x25e   : > { %3106 = vrcp.f32 %v1499_v2  ;;  %v1538_v23 = vmul.f32 %v3095_v44, %v1361_v6  ;;  %1809 = vmatmul.mubr.bf16.gmra.mrb[40].mxu0 %v1634_v37  ;;  %v3097_v60 = vpop.eup %3096 }
 0x25f   : > { %1818 = vmatprep.mubr.bf16.mxu0 %v4210_v1  ;;  %v1613_v0 = vadd.f32 %v1600_v48, %v1587_v41  ;;  %v1575_v18 = vsub.f32 1.0, %v3097_v60  ;;  %v1601_v27 = vmul.f32 %v3097_v60, %v3715_v62 }
 0x260   : > { %v3099_v50 = vpop.eup %3098  ;;  %v1551_v43 = vadd.f32 %v1538_v23, %v1359_v61 }
 0x261   : > { %v1539_v38 = vmul.f32 %v3099_v50, %v1367_v52  ;;  %1626 = vst [vmem:[%s3880_s11 + $0x40] sm:$0xff] %v1613_v0  ;;  %v3101_v63 = vpop.eup %3100 }
 0x262   : > { %3108 = vtanh.f32 %v1551_v43  ;;  %v1576_v46 = vsub.f32 1.0, %v3101_v63  ;;  %v1602_v8 = vmul.f32 %v3101_v63, %v3727_v10 }
 0x263   : > { %3110 = vrcp.f32 %v1500_v5  ;;  %v1552_v26 = vadd.f32 %v1539_v38, %v1365_v34 }
 0x264   : > { %v3103_v24 = vpop.eup %3102 }
 0x265   : > { %3112 = vtanh.f32 %v1552_v26  ;;  %v1588_v35 = vmul.f32 %v3103_v24, %v1575_v18 }
 0x267   : > { %v3105_v4 = vpop.eup %3104  ;;  %v1614_v59 = vadd.f32 %v1601_v27, %v1588_v35 }
 0x268   : > { %v3107_v55 = vpop.eup %3106  ;;  %v1589_v47 = vmul.f32 %v3105_v4, %v1576_v46 }
 0x269   : > { %1627 = vst [vmem:[%s3880_s11 + $0x48] sm:$0xff] %v1614_v59  ;;  %v1635_v16 = vpack.c.bf16 %v1614_v59, %v1613_v0  ;;  %v1577_v51 = vsub.f32 1.0, %v3107_v55  ;;  %v1603_v32 = vmul.f32 %v3107_v55, %v3725_v9  ;;  %v2981_v9 = vld [vmem:[#allocation9 + $0xf0] ss:$8 sps:$4 sm:$0xff]  }
 0x26a   : > { %v1615_v7 = vadd.f32 %v1602_v8, %v1589_v47  ;;  %2122 = vmatpush1.bf16.msra.mxu1 %v2981_v9 }
 0x26b   : > { %1819 = vmatmul.mubr.bf16.gmra.mrb[44].mxu0 %v1635_v16 }
 0x26c   : > { %v3109_v3 = vpop.eup %3108  ;;  %1828 = vmatprep.mubr.bf16.mxu0 %v4210_v1  ;;  %1628 = vst [vmem:[%s3880_s11 + $0x50] sm:$0xff] %v1615_v7 }
 0x26d   : > { %v3111_v12 = vpop.eup %3110  ;;  %v1590_v62 = vmul.f32 %v3109_v3, %v1577_v51 }
 0x26e   : > { %v1578_v20 = vsub.f32 1.0, %v3111_v12  ;;  %v1604_v10 = vmul.f32 %v3111_v12, %v3734_v17  ;;  %v1654_v17 = vld [vmem:[%s4165_s6] sm:$0x3] }
 0x26f   : > { %v3113_v42 = vpop.eup %3112  ;;  %v1616_v33 = vadd.f32 %v1603_v32, %v1590_v62  ;;  %v3953_v53 = vrot.slane %v1654_v17, %v3743_v54 }
 0x270   : > { %v1591_v29 = vmul.f32 %v3113_v42, %v1578_v20 }
 0x271   : > { %1629 = vst [vmem:[%s3880_s11 + $0x58] sm:$0xff] %v1616_v33  ;;  %v1636_v58 = vpack.c.bf16 %v1616_v33, %v1615_v7 }
 0x272   : > { %v1617_v25 = vadd.f32 %v1604_v10, %v1591_v29 }
 0x273   : > { %1829 = vmatmul.mubr.bf16.gmra.mrb[48].mxu0 %v1636_v58 }
 0x274   : > { %1838 = vmatprep.mubr.bf16.mxu0 %v4210_v1  ;;  %1630 = vst [vmem:[%s3880_s11 + $0x60] sm:$0xff] %v1617_v25  ;;  %v1637_v13 = vpack.c.bf16 %v1617_v25, %v1617_v25  ;;  %v3956_v1 = vrot.slane %v1654_v17, %v3751_v57 }
 0x27b   : > { %1839 = vmatmul.mubr.bf16.gmra.mrb[52].mxu0 %v1637_v13 }
 0x318   : > { %v1780_v36 = vpop.f32.mrb[28].mxu0 }
 0x319   : > { %v1781_v22 = vadd.f32 %v1780_v36, %v3953_v53  ;;  %v1782_v39 = vpop.f32.mrb[29].mxu0 }
 0x31a   : > { %v1783_v21 = vadd.f32 %v1782_v39, %v3956_v1  ;;  %v1784_v19 = vpop.f32.mrb[30].mxu0 }
 0x31b   : > { %v1785_v56 = vadd.f32 %v1784_v19, %v3953_v53  ;;  %v1786_v40 = vpop.f32.mrb[31].mxu0  ;;  %v1847_v15 = vmax.f32 %v1781_v22, 0.0 }
 0x31c   : > { %v1787_v2 = vadd.f32 %v1786_v40, %v3956_v1  ;;  %v1848_v30 = vmax.f32 %v1783_v21, 0.0 }
 0x31d   : > { %v1849_v49 = vmax.f32 %v1785_v56, 0.0 }
 0x31e   : > { %v1850_v45 = vmax.f32 %v1787_v2, 0.0 }
 0x31f   : > { %v1873_v31 = vpack.c.bf16 %v1849_v49, %v1847_v15 }
 0x320   : > { %v1874_v6 = vpack.c.bf16 %v1850_v45, %v1848_v30  ;;  %v1790_v37 = vpop.f32.mrb[32].mxu0 }
 0x321   : > { %v1791_v44 = vadd.f32 %v1790_v37, %v3953_v53  ;;  %v1792_v52 = vpop.f32.mrb[33].mxu0 }
 0x322   : > { %v1793_v41 = vadd.f32 %v1792_v52, %v3956_v1  ;;  %v1794_v48 = vpop.f32.mrb[34].mxu0  ;;  %2123 = vmatprep.mubr.bf16.mxu1 %v1874_v6 }
 0x323   : > { %v1795_v61 = vadd.f32 %v1794_v48, %v3953_v53  ;;  %v1796_v23 = vpop.f32.mrb[35].mxu0  ;;  %2124 = vmatmul.mubr.bf16.vlgmr.msra.gmra.mrb[28].mxu1 %v1873_v31  ;;  %v1851_v5 = vmax.f32 %v1791_v44, 0.0 }
 0x324   : > { %v1797_v60 = vadd.f32 %v1796_v23, %v3956_v1  ;;  %v1852_v0 = vmax.f32 %v1793_v41, 0.0 }
 0x325   : > { %v1853_v34 = vmax.f32 %v1795_v61, 0.0 }
 0x326   : > { %v1854_v50 = vmax.f32 %v1797_v60, 0.0 }
 0x327   : > { %v1875_v43 = vpack.c.bf16 %v1853_v34, %v1851_v5 }
 0x328   : > { %v1876_v38 = vpack.c.bf16 %v1854_v50, %v1852_v0  ;;  %v1800_v63 = vpop.f32.mrb[36].mxu0 }
 0x329   : > { %v1801_v26 = vadd.f32 %v1800_v63, %v3953_v53  ;;  %v1802_v18 = vpop.f32.mrb[37].mxu0 }
 0x32a   : > { %v1803_v24 = vadd.f32 %v1802_v18, %v3956_v1  ;;  %v1804_v35 = vpop.f32.mrb[38].mxu0  ;;  %2133 = vmatprep.mubr.bf16.mxu1 %v1876_v38 }
 0x32b   : > { %v1805_v27 = vadd.f32 %v1804_v35, %v3953_v53  ;;  %v1806_v46 = vpop.f32.mrb[39].mxu0  ;;  %2134 = vmatmul.mubr.bf16.gmra.mrb[32].mxu1 %v1875_v43  ;;  %v1855_v59 = vmax.f32 %v1801_v26, 0.0 }
 0x32c   : > { %v1807_v4 = vadd.f32 %v1806_v46, %v3956_v1  ;;  %v1856_v47 = vmax.f32 %v1803_v24, 0.0  ;;  %v3345_v46 = vmov 0.0  }
 0x32d   : > { %v1857_v55 = vmax.f32 %v1805_v27, 0.0  ;;  %2707 = vmatprep.subr.bf16.mxu0 %v3345_v46  ;;  %2721 = vmatprep.mubr.msk.bf16.mxu0 %vm3346_vm0, %v3345_v46 }
 0x32e   : > { %v1858_v8 = vmax.f32 %v1807_v4, 0.0 }
 0x32f   : > { %v1877_v16 = vpack.c.bf16 %v1857_v55, %v1855_v59 }
 0x330   : > { %v1878_v7 = vpack.c.bf16 %v1858_v8, %v1856_v47 }
 0x331   : > { %v1810_v51 = vpop.f32.mrb[40].mxu0 }
 0x332   : > { %v1811_v3 = vadd.f32 %v1810_v51, %v3953_v53  ;;  %v1812_v12 = vpop.f32.mrb[41].mxu0  ;;  %2143 = vmatprep.mubr.bf16.mxu1 %v1878_v7 }
 0x333   : > { %v1813_v62 = vadd.f32 %v1812_v12, %v3956_v1  ;;  %v1814_v32 = vpop.f32.mrb[42].mxu0  ;;  %2144 = vmatmul.mubr.bf16.gmra.mrb[36].mxu1 %v1877_v16 }
 0x334   : > { %v1815_v20 = vadd.f32 %v1814_v32, %v3953_v53  ;;  %v1816_v42 = vpop.f32.mrb[43].mxu0  ;;  %v1859_v29 = vmax.f32 %v1811_v3, 0.0 }
 0x335   : > { %v1817_v33 = vadd.f32 %v1816_v42, %v3956_v1  ;;  %v1860_v58 = vmax.f32 %v1813_v62, 0.0 }
 0x336   : > { %v1861_v10 = vmax.f32 %v1815_v20, 0.0 }
 0x337   : > { %v1862_v25 = vmax.f32 %v1817_v33, 0.0 }
 0x338   : > { %v1879_v13 = vpack.c.bf16 %v1861_v10, %v1859_v29 }
 0x339   : > { %v1880_v28 = vpack.c.bf16 %v1862_v25, %v1860_v58 }
 0x33b   : > { %2153 = vmatprep.mubr.bf16.mxu1 %v1880_v28 }
 0x33c   : > { %2154 = vmatmul.mubr.bf16.gmra.mrb[40].mxu1 %v1879_v13 }
 0x33e   : > { %v1820_v14 = vpop.f32.mrb[44].mxu0 }
 0x33f   : > { %v1821_v11 = vadd.f32 %v1820_v14, %v3953_v53  ;;  %v1822_v9 = vpop.f32.mrb[45].mxu0 }
 0x340   : > { %v1823_v17 = vadd.f32 %v1822_v9, %v3956_v1  ;;  %v1824_v36 = vpop.f32.mrb[46].mxu0 }
 0x341   : > { %v1825_v22 = vadd.f32 %v1824_v36, %v3953_v53  ;;  %v1826_v39 = vpop.f32.mrb[47].mxu0  ;;  %v1863_v19 = vmax.f32 %v1821_v11, 0.0 }
 0x342   : > { %v1827_v21 = vadd.f32 %v1826_v39, %v3956_v1  ;;  %v1864_v40 = vmax.f32 %v1823_v17, 0.0 }
 0x343   : > { %v1865_v56 = vmax.f32 %v1825_v22, 0.0 }
 0x344   : > { %v1866_v2 = vmax.f32 %v1827_v21, 0.0 }
 0x345   : > { %v1881_v15 = vpack.c.bf16 %v1865_v56, %v1863_v19 }
 0x346   : > { %v1882_v49 = vpack.c.bf16 %v1866_v2, %v1864_v40  ;;  %v1830_v30 = vpop.f32.mrb[48].mxu0 }
 0x347   : > { %v1831_v45 = vadd.f32 %v1830_v30, %v3953_v53  ;;  %v1832_v31 = vpop.f32.mrb[49].mxu0 }
 0x348   : > { %v1833_v6 = vadd.f32 %v1832_v31, %v3956_v1  ;;  %v1834_v37 = vpop.f32.mrb[50].mxu0  ;;  %2163 = vmatprep.mubr.bf16.mxu1 %v1882_v49 }
 0x349   : > { %v1835_v44 = vadd.f32 %v1834_v37, %v3953_v53  ;;  %v1836_v52 = vpop.f32.mrb[51].mxu0  ;;  %2164 = vmatmul.mubr.bf16.gmra.mrb[44].mxu1 %v1881_v15  ;;  %v1867_v48 = vmax.f32 %v1831_v45, 0.0 }
 0x34a   : > { %v1837_v41 = vadd.f32 %v1836_v52, %v3956_v1  ;;  %v1868_v23 = vmax.f32 %v1833_v6, 0.0 }
 0x34b   : > { %v1869_v61 = vmax.f32 %v1835_v44, 0.0 }
 0x34c   : > { %v1870_v60 = vmax.f32 %v1837_v41, 0.0 }
 0x34d   : > { %v1883_v5 = vpack.c.bf16 %v1869_v61, %v1867_v48 }
 0x34e   : > { %v1884_v34 = vpack.c.bf16 %v1870_v60, %v1868_v23  ;;  %v1840_v0 = vpop.f32.mrb[52].mxu0 }
 0x34f   : > { %v1841_v50 = vadd.f32 %v1840_v0, %v3953_v53  ;;  %v1842_v43 = vpop.f32.mrb[53].mxu0  ;;  %v1919_v53 = vld [vmem:[%s4167_s8] sm:$0x3] }
 0x350   : > { %v1843_v38 = vadd.f32 %v1842_v43, %v3956_v1  ;;  %v1844_v63 = vpop.f32.mrb[54].mxu0  ;;  %2173 = vmatprep.mubr.bf16.mxu1 %v1884_v34  ;;  %v3990_v1 = vrot.slane %v1919_v53, %v3743_v54  ;;  %v3993_v4 = vrot.slane %v1919_v53, %v3751_v57 }
 0x351   : > { %v1845_v26 = vpop.f32.mrb[55].mxu0  ;;  %2174 = vmatmul.mubr.bf16.gmra.mrb[48].mxu1 %v1883_v5  ;;  %v1871_v24 = vmax.f32 %v1841_v50, 0.0 }
 0x352   : > { %v1872_v18 = vmax.f32 %v1843_v38, 0.0 }
 0x353   : > { %v1885_v27 = vpack.c.bf16 %v1871_v24, %v1871_v24 }
 0x354   : > { %v1886_v35 = vpack.c.bf16 %v1872_v18, %v1872_v18 }
 0x356   : > { %2183 = vmatprep.mubr.bf16.mxu1 %v1886_v35 }
 0x359   : > { %2184 = vmatmul.mubr.bf16.gmra.mrb[52].mxu1 %v1885_v27 }
 0x3f6   : > { %v2125_v59 = vpop.f32.mrb[28].mxu1 }
 0x3f7   : > { %v2126_v55 = vadd.f32 %v2125_v59, %v3990_v1  ;;  %v2127_v47 = vpop.f32.mrb[29].mxu1 }
 0x3f8   : > { %v2128_v8 = vadd.f32 %v2127_v47, %v3993_v4  ;;  %v2129_v16 = vpop.f32.mrb[30].mxu1 }
 0x3f9   : > { %v2192_v7 = vmax.f32 %v2126_v55, 0.0  ;;  %v2130_v51 = vadd.f32 %v2129_v16, %v3990_v1  ;;  %v2131_v3 = vpop.f32.mrb[31].mxu1 }
 0x3fa   : > { %v2132_v12 = vadd.f32 %v2131_v3, %v3993_v4  ;;  %v2193_v57 = vmax.f32 %v2128_v8, 0.0 }
 0x3fb   : > { %2218 = vst [vmem:[%s4000_s12] sm:$0xff] %v2192_v7  ;;  %v2194_v54 = vmax.f32 %v2130_v51, 0.0 }
 0x3fc   : > { %v2195_v62 = vmax.f32 %v2132_v12, 0.0 }
 0x3fd   : > { %2219 = vst [vmem:[%s4000_s12 + $0x8] sm:$0xff] %v2194_v54 }
 0x3fe   : > { %v2232_v32 = vpack.c.bf16 %v2195_v62, %v2193_v57  ;;  %v2135_v20 = vpop.f32.mrb[32].mxu1 }
 0x3ff   : > { %v2136_v42 = vadd.f32 %v2135_v20, %v3990_v1  ;;  %v2137_v33 = vpop.f32.mrb[33].mxu1 }
 0x400   : > { %v2138_v29 = vadd.f32 %v2137_v33, %v3993_v4  ;;  %v2139_v10 = vpop.f32.mrb[34].mxu1  ;;  %2708 = vmatpush3.bf16.xpose.msra.mxu0 %v2232_v32 }
 0x401   : > { %v2196_v58 = vmax.f32 %v2136_v42, 0.0  ;;  %v2140_v25 = vadd.f32 %v2139_v10, %v3990_v1  ;;  %v2141_v13 = vpop.f32.mrb[35].mxu1  ;;  %2709 = vmatprep.subr.bf16.mxu0 %v3345_v46 }
 0x402   : > { %v2142_v28 = vadd.f32 %v2141_v13, %v3993_v4  ;;  %v2197_v11 = vmax.f32 %v2138_v29, 0.0 }
 0x403   : > { %2220 = vst [vmem:[%s4000_s12 + $0x10] sm:$0xff] %v2196_v58  ;;  %v2198_v14 = vmax.f32 %v2140_v25, 0.0 }
 0x404   : > { %v2199_v9 = vmax.f32 %v2142_v28, 0.0 }
 0x405   : > { %2221 = vst [vmem:[%s4000_s12 + $0x18] sm:$0xff] %v2198_v14 }
 0x406   : > { %v2233_v17 = vpack.c.bf16 %v2199_v9, %v2197_v11  ;;  %v2145_v36 = vpop.f32.mrb[36].mxu1 }
 0x407   : > { %v2146_v22 = vadd.f32 %v2145_v36, %v3990_v1  ;;  %v2147_v39 = vpop.f32.mrb[37].mxu1  ;;  %v2231_v36 = vld [vmem:[%s4211_s26] sm:$0xf] }
 0x408   : > { %v2148_v21 = vadd.f32 %v2147_v39, %v3993_v4  ;;  %v2149_v19 = vpop.f32.mrb[38].mxu1  ;;  %2710 = vmatpush3.bf16.xpose.msra.mxu0 %v2233_v17 }
 0x409   : > { %v2200_v56 = vmax.f32 %v2146_v22, 0.0  ;;  %v2150_v40 = vadd.f32 %v2149_v19, %v3990_v1  ;;  %v2151_v2 = vpop.f32.mrb[39].mxu1  ;;  %2711 = vmatprep.subr.bf16.mxu0 %v3345_v46 }
 0x40a   : > { %v2152_v15 = vadd.f32 %v2151_v2, %v3993_v4  ;;  %v2201_v30 = vmax.f32 %v2148_v21, 0.0 }
 0x40b   : > { %2222 = vst [vmem:[%s4000_s12 + $0x20] sm:$0xff] %v2200_v56  ;;  %v2202_v49 = vmax.f32 %v2150_v40, 0.0 }
 0x40c   : > { %v2203_v45 = vmax.f32 %v2152_v15, 0.0 }
 0x40d   : > { %2223 = vst [vmem:[%s4000_s12 + $0x28] sm:$0xff] %v2202_v49 }
 0x40e   : > { %v2234_v31 = vpack.c.bf16 %v2203_v45, %v2201_v30 }
 0x40f   : > { %v2155_v6 = vpop.f32.mrb[40].mxu1 }
 0x410   : > { %v2156_v37 = vadd.f32 %v2155_v6, %v3990_v1  ;;  %v2157_v44 = vpop.f32.mrb[41].mxu1  ;;  %2712 = vmatpush3.bf16.xpose.msra.mxu0 %v2234_v31 }
 0x411   : > { %v2158_v52 = vadd.f32 %v2157_v44, %v3993_v4  ;;  %v2159_v41 = vpop.f32.mrb[42].mxu1  ;;  %2713 = vmatprep.subr.bf16.mxu0 %v3345_v46 }
 0x412   : > { %v2204_v48 = vmax.f32 %v2156_v37, 0.0  ;;  %v2160_v61 = vadd.f32 %v2159_v41, %v3990_v1  ;;  %v2161_v23 = vpop.f32.mrb[43].mxu1 }
 0x413   : > { %v2162_v60 = vadd.f32 %v2161_v23, %v3993_v4  ;;  %v2205_v34 = vmax.f32 %v2158_v52, 0.0 }
 0x414   : > { %2224 = vst [vmem:[%s4000_s12 + $0x30] sm:$0xff] %v2204_v48  ;;  %v2206_v5 = vmax.f32 %v2160_v61, 0.0 }
 0x415   : > { %v2207_v0 = vmax.f32 %v2162_v60, 0.0 }
 0x416   : > { %2225 = vst [vmem:[%s4000_s12 + $0x38] sm:$0xff] %v2206_v5 }
 0x417   : > { %v2235_v50 = vpack.c.bf16 %v2207_v0, %v2205_v34 }
 0x419   : > { %2714 = vmatpush3.bf16.xpose.msra.mxu0 %v2235_v50 }
 0x41a   : > { %2715 = vmatprep.subr.bf16.mxu0 %v3345_v46 }
 0x41c   : > { %v2165_v43 = vpop.f32.mrb[44].mxu1 }
 0x41d   : > { %v2166_v38 = vadd.f32 %v2165_v43, %v3990_v1  ;;  %v2167_v63 = vpop.f32.mrb[45].mxu1 }
 0x41e   : > { %v2168_v26 = vadd.f32 %v2167_v63, %v3993_v4  ;;  %v2169_v18 = vpop.f32.mrb[46].mxu1 }
 0x41f   : > { %v2208_v24 = vmax.f32 %v2166_v38, 0.0  ;;  %v2170_v35 = vadd.f32 %v2169_v18, %v3990_v1  ;;  %v2171_v27 = vpop.f32.mrb[47].mxu1 }
 0x420   : > { %v2172_v53 = vadd.f32 %v2171_v27, %v3993_v4  ;;  %v2209_v55 = vmax.f32 %v2168_v26, 0.0 }
 0x421   : > { %2226 = vst [vmem:[%s4000_s12 + $0x40] sm:$0xff] %v2208_v24  ;;  %v2210_v59 = vmax.f32 %v2170_v35, 0.0 }
 0x422   : > { %v2211_v47 = vmax.f32 %v2172_v53, 0.0 }
 0x423   : > { %2227 = vst [vmem:[%s4000_s12 + $0x48] sm:$0xff] %v2210_v59 }
 0x424   : > { %v2236_v8 = vpack.c.bf16 %v2211_v47, %v2209_v55  ;;  %v2175_v16 = vpop.f32.mrb[48].mxu1 }
 0x425   : > { %v2176_v7 = vadd.f32 %v2175_v16, %v3990_v1  ;;  %v2177_v51 = vpop.f32.mrb[49].mxu1 }
 0x426   : > { %v2178_v3 = vadd.f32 %v2177_v51, %v3993_v4  ;;  %v2179_v12 = vpop.f32.mrb[50].mxu1  ;;  %2716 = vmatpush3.bf16.xpose.msra.mxu0 %v2236_v8 }
 0x427   : > { %v2212_v54 = vmax.f32 %v2176_v7, 0.0  ;;  %v2180_v57 = vadd.f32 %v2179_v12, %v3990_v1  ;;  %v2181_v62 = vpop.f32.mrb[51].mxu1  ;;  %2717 = vmatprep.subr.bf16.mxu0 %v3345_v46 }
 0x428   : > { %v2182_v32 = vadd.f32 %v2181_v62, %v3993_v4  ;;  %v2213_v42 = vmax.f32 %v2178_v3, 0.0 }
 0x429   : > { %2228 = vst [vmem:[%s4000_s12 + $0x50] sm:$0xff] %v2212_v54  ;;  %v2214_v20 = vmax.f32 %v2180_v57, 0.0 }
 0x42a   : > { %v2215_v33 = vmax.f32 %v2182_v32, 0.0 }
 0x42b   : > { %2229 = vst [vmem:[%s4000_s12 + $0x58] sm:$0xff] %v2214_v20 }
 0x42c   : > { %v2237_v29 = vpack.c.bf16 %v2215_v33, %v2213_v42  ;;  %v2185_v10 = vpop.f32.mrb[52].mxu1 }
 0x42d   : > { %v2186_v58 = vadd.f32 %v2185_v10, %v3990_v1  ;;  %v2187_v25 = vpop.f32.mrb[53].mxu1  ;;  %v2247_v1 = vpop.permute.xlu1 %2246 }
 0x42e   : > { %v2188_v13 = vadd.f32 %v2187_v25, %v3993_v4  ;;  %v2189_v28 = vpop.f32.mrb[54].mxu1  ;;  %2718 = vmatpush3.bf16.xpose.msra.mxu0 %v2237_v29 }
 0x42f   : > { %v2216_v14 = vmax.f32 %v2186_v58, 0.0  ;;  %v2190_v11 = vpop.f32.mrb[55].mxu1  ;;  %2719 = vmatprep.subr.bf16.mxu0 %v3345_v46 }
 0x430   : > { %v2217_v9 = vmax.f32 %v2188_v13, 0.0 }
 0x431   : > { %2230 = vst [vmem:[%s4000_s12 + $0x60] sm:$0xff] %v2216_v14 }
 0x432   : > { %v2238_v17 = vpack.c.bf16 %v2217_v9, %v2217_v9 }
 0x436   : > { %2720 = vmatpush3.bf16.xpose.msra.mxu0 %v2238_v17 }
 0x43d   : > { %2722 = vmatmul.mubr.bf16.vlgmr.msra.gmra.mrb[56].mxu0 %v2231_v36 }
 0x50d   : > { %2310 = sbr.rel (!%p4214_p3) target bundleno = 1329 (0x531), region = 88 }
 0x510   : > { %v2283_v46 = vpop.f32.mrb[56].mxu0 }
 0x511   : > { %v2284_v4 = vadd.f32 %v2283_v46, %v2247_v1  ;;  %v2723_v22 = vpop.f32.mrb[57].mxu0 }
 0x512   : > { %v2286_v39 = vpop.f32.mrb[58].mxu0 }
 0x513   : > { %2290 = vst.msk [vmem:[%s620_s24] sm:$0xff] %vm2289_vm1, %v2284_v4  ;;  %v2724_v21 = vpop.f32.mrb[59].mxu0 }
 0x514   : > { %s4230_s19 = smov (!%p2313_p5, %s2312_s19), 13 }
 0x515   : > { %s4056_s17 = sshll.u32 %s4230_s19, 7 }
 0x516   : > { %s2317_s16 = ssub.s32 1664, %s4056_s17 }
 0x517   : > { %2318 = vsyncadd %s2296_s27, %s2317_s16  ;;  %p2685_p11 = scmp.ne.s32.totalorder %s4056_s17, 0  ;;  %s2697_s25 = smul.u32 1664, %s3447_s10 }
 0x518   : > { %s2323_s20 = sshll.u32 %s4000_s12, 4  ;;  %s4215_s15 = sld [smem:[#allocation27_spill]]  ;;  %s4069_s20 = int_to_ptr.vmem [resolvable:$true] %s2323_s20 }
 0x519   : > { %s3226_s21 = scalar_lea.vmem %s4069_s20, %s4056_s17  ;;  %s3347_s3 = smov [#allocation11]  }
 0x51a   : > { %p3227_p13 = scmp.ne.s32.totalorder %s4069_s20, %s3226_s21  ;;  %s3230_s24 = sshll.u32 %s3347_s3, 4  ;;  %s3231_s24 = int_to_ptr.vmem [resolvable:$false] %s3230_s24 }
 0x51b   : > { %s3232_s22 = scalar_lea.vmem %s3231_s24, 3328  ;;  %p3233_p7 = scmp.lt.s32.totalorder %s4069_s20, %s3231_s24 }
 0x51c   : > { %p3228_p0 = pnand %p3227_p13, %p2685_p11  ;;  %p3234_p2 = scmp.lt.s32.totalorder %s3232_s22, %s3226_s21 }
 0x51e   : > { %s4067_s18 = scalar_lea.hbm %s4215_s15, %s2697_s25  ;;  %p3229_p12 = pneg %p3228_p0 }
 0x51f   : > { %p3235_p8 = por %p3234_p2, %p3233_p7 }
 0x521   : > { %p3236_p9 = pnand %p3235_p8, %p3229_p12 }
 0x523   : > { %3239 = shalt.err (!%p3236_p9)
}
 0x524   : > { %s3240_s12 = scalar_lea.hbm %s4067_s18, %s4056_s17  ;;  %s3244_s25 = scalar_lea.hbm %s4215_s15, 3200 }
 0x525   : > { %p3241_p10 = scmp.ne.s32.totalorder %s4067_s18, %s3240_s12  ;;  %p3245_p3 = scmp.lt.u32.totalorder %s4067_s18, %s4215_s15 }
 0x526   : > { %p3246_p5 = scmp.lt.u32.totalorder %s3244_s25, %s3240_s12  ;;  %p3248_p0 = scmp.lt.u32.totalorder %s3240_s12, %s4067_s18 }
 0x527   : > { %p3242_p1 = pnand %p3241_p10, %p2685_p11 }
 0x528   : > { %p3247_p13 = por %p3246_p5, %p3245_p3 }
 0x529   : > { %p3243_p6 = pneg %p3242_p1 }
 0x52a   : > { %p3249_p12 = por %p3248_p0, %p3247_p13 }
 0x52c   : > { %p3250_p7 = pnand %p3249_p12, %p3243_p6 }
 0x52e   : > { %3253 = shalt.err (!%p3250_p7)
}
 0x52f   : > { %s3348_s21 = smov 128   ;;  %s3349_s3 = smov 8  }
 0x530   : > { %2329 = dma.vmem_to_hbm [thread:$0]  (%p2685_p11), %s4069_s20, %s4056_s17, %s4067_s18, %s2296_s27, %s3348_s21, %s3348_s21, %s3349_s3  }
 0x531 PF: > { %s4216_s24 = sld [smem:[#allocation22_spill]] }
 0x537   : > { %p4217_p2 = scmp.ne.s32.totalorder %s4216_s24, 0 }
 0x538   : > { %s2334_s22 = ssub.s32 (%p4217_p2), 25, %s3637_s23 }
 0x539   : > { %2332 = sbr.rel (!%p4217_p2) target bundleno = 1373 (0x55d), region = 92  ;;  %p2335_p8 = scmp.lt.s32.totalorder (%p4217_p2), %s2334_s22, 13 }
 0x540   : > { %s4232_s22 = smov (!%p2335_p8, %s2334_s22), 13 }
 0x541   : > { %s4100_s12 = sshll.u32 %s4232_s22, 7 }
 0x542   : > { %s2339_s19 = ssub.s32 1664, %s4100_s12 }
 0x543   : > { %2340 = vsyncadd %s2301_s13, %s2339_s19  ;;  %p2690_p11 = scmp.ne.s32.totalorder %s4100_s12, 0  ;;  %s2698_s27 = smul.u32 1664, %s3447_s10 }
 0x544   : > { %s2345_s17 = sshll.u32 %s3880_s11, 4  ;;  %s4218_s16 = sld [smem:[#allocation28_spill]]  ;;  %s4113_s17 = int_to_ptr.vmem [resolvable:$true] %s2345_s17 }
 0x545   : > { %s3254_s25 = scalar_lea.vmem %s4113_s17, %s4100_s12  ;;  %s3350_s26 = smov [#allocation12]  }
 0x546   : > { %p3255_p9 = scmp.ne.s32.totalorder %s4113_s17, %s3254_s25  ;;  %s3258_s9 = sshll.u32 %s3350_s26, 4  ;;  %s3259_s9 = int_to_ptr.vmem [resolvable:$false] %s3258_s9 }
 0x547   : > { %s3260_s10 = scalar_lea.vmem %s3259_s9, 3328  ;;  %p3261_p6 = scmp.lt.s32.totalorder %s4113_s17, %s3259_s9 }
 0x548   : > { %p3256_p10 = pnand %p3255_p9, %p2690_p11  ;;  %p3262_p3 = scmp.lt.s32.totalorder %s3260_s10, %s3254_s25 }
 0x54a   : > { %s4111_s23 = scalar_lea.hbm %s4218_s16, %s2698_s27  ;;  %p3257_p1 = pneg %p3256_p10 }
 0x54b   : > { %p3263_p5 = por %p3262_p3, %p3261_p6 }
 0x54d   : > { %p3264_p13 = pnand %p3263_p5, %p3257_p1 }
 0x54f   : > { %3267 = shalt.err (!%p3264_p13)
}
 0x550   : > { %s3268_s11 = scalar_lea.hbm %s4111_s23, %s4100_s12  ;;  %s3272_s24 = scalar_lea.hbm %s4218_s16, 3200 }
 0x551   : > { %p3269_p0 = scmp.ne.s32.totalorder %s4111_s23, %s3268_s11  ;;  %p3273_p2 = scmp.lt.u32.totalorder %s4111_s23, %s4218_s16 }
 0x552   : > { %p3274_p8 = scmp.lt.u32.totalorder %s3272_s24, %s3268_s11  ;;  %p3276_p10 = scmp.lt.u32.totalorder %s3268_s11, %s4111_s23 }
 0x553   : > { %p3270_p12 = pnand %p3269_p0, %p2690_p11 }
 0x554   : > { %p3275_p9 = por %p3274_p8, %p3273_p2 }
 0x555   : > { %p3271_p7 = pneg %p3270_p12 }
 0x556   : > { %p3277_p1 = por %p3276_p10, %p3275_p9 }
 0x558   : > { %p3278_p6 = pnand %p3277_p1, %p3271_p7 }
 0x55a   : > { %3281 = shalt.err (!%p3278_p6)
}
 0x55b   : > { %s3351_s27 = smov 128   ;;  %s3352_s20 = smov 8  }
 0x55c   : > { %2351 = dma.vmem_to_hbm [thread:$0]  (%p2690_p11), %s4113_s17, %s4100_s12, %s4111_s23, %s2301_s13, %s3351_s27, %s3351_s27, %s3352_s20  }
 0x55d PF: > { %s4219_s18 = sld [smem:[#allocation19_spill]]  ;;  %s4220_s25 = sld [smem:[#allocation23_spill]] }
 0x563   : > { %s2367_s26 = sand.u32 1, %s4219_s18   ;;  %p4221_p3 = scmp.ne.s32.totalorder %s4220_s25, 0 }
 0x564   : > { %s2368_s9 = scalar_lea.sflag [#allocation5], %s2367_s26 }
 0x565   : > { %p2753_p5 = pnand %p2532_p4, %p4221_p3 }
 0x567   : > { %3311 = dma.done.wait (!%p2753_p5), %s2368_s9, 1664  }
 0x568   : > { %3313 = vsyncadd (!%p2753_p5), %s2368_s9, 4294965632  ;;  %s2377_s10 = scalar_lea.sflag [#allocation13], %s2367_s26 }
 0x569   : > { %3315 = dma.done.wait (!%p2753_p5), %s2377_s10, 1664  }
 0x56a   : > { %3317 = vsyncadd (!%p2753_p5), %s2377_s10, 4294965632  ;;  %s4222_s30 = sld [smem:[#allocation20_spill]]  ;;  %s4223_s14 = sld [smem:[#allocation21_spill]] }
 0x56b   : > { %s4224_s27 = smov %s3324_s28  ;;  %s4225_s28 = smov %s3328_s29 }
 0x570   : > { %p34_p11 = scmp.ge.s32.totalorder %s4222_s30, 4   ;;  %s4226_s29 = smov %s4223_s14 }
 0x572   :  { %36 = sbr.rel (!%p34_p11) target bundleno = 15 (0xf), region = 156 }
 0x579   :  { %2382 = vsyncpa [#allocation4], 1 }
 0x57a   :  { %2384 = vsyncpa [#allocation4 + $0x1], 1 }
 0x57b   :  { %2385 = vsyncpa [#allocation7], 1 }
 0x57c   :  { %2386 = vsyncpa [#allocation10], 1 }
 0x57d   :  { %2387 = vsyncpa [#allocation5], 1 }
 0x57e   :  { %2389 = vsyncpa [#allocation5 + $0x1], 1 }
 0x57f   :  { %2390 = vsyncpa [#allocation13], 1 }
 0x580   :  { %2392 = vsyncpa [#allocation13 + $0x1], 1 }

</bundles_post_ra>
